<compile_context>
chip_gen: v7x
topology: tpu7x:2x2x1
jax: 0.10.0
libtpu: 0.0.40
codegen_flags: <defaults>
</compile_context>

<pallas_src>
import jax
import jax.numpy as jnp
from jax import lax
from jax.experimental import pallas as pl
from jax.experimental.pallas import tpu as pltpu


LANE = 128     # TPU lane width; channel dims are padded to this for lane density
SUBLANE = 8    # sublane width; W must be a multiple so reshapes are free


def _bottleneck_kernel(x_ref, w1sc_ref, b1_ref, w2_ref, b2_ref, w3_ref,
                       b3sc_ref, o_ref):
    # x_ref: (1, 1, TH+2, W, Cp) bf16 — one batch element, one row tile with a
    # 1-row halo above/below, channels zero-padded to the lane width.
    _, _, HH, W, Cp = x_ref.shape
    TH = HH - 2
    Pp = w3_ref.shape[1]
    Mh = HH * W          # rows incl. halo
    M = TH * W           # output rows

    # ---- conv1 (1x1) + shortcut 1x1 fused into one 256-lane-wide matmul ----
    # BN scales are pre-folded into the weights; only bias (+ReLU) remains.
    x = x_ref[...].reshape(Mh, Cp)
    h1sc = jnp.dot(x, w1sc_ref[...], preferred_element_type=jnp.float32)
    h1sc = h1sc.reshape(HH, W, 2 * Pp)

    h1 = jnp.maximum(h1sc[:, :, :Pp] + b1_ref[...], 0.0).astype(w2_ref.dtype)
    # Raw shortcut on the TH interior rows; its BN bias is folded into b3sc.
    sc = h1sc[1:TH + 1, :, Pp:].reshape(M, Pp)

    # Image-boundary halo rows must be zero (SAME padding pads conv2's input
    # h1, not x); interior-tile halo rows are real neighbor rows and stay.
    t = pl.program_id(1)
    last_t = pl.num_programs(1) - 1
    row = lax.broadcasted_iota(jnp.int32, (HH, W, Pp), 0)
    edge = ((row == 0) & (t == 0)) | ((row == HH - 1) & (t == last_t))
    h1 = jnp.where(edge, jnp.zeros_like(h1), h1)

    # ---- W-halo slabs (kx = 0, 1, 2), built once, reused across ky ----------
    zcol = jnp.zeros((HH, 1, Pp), h1.dtype)
    slabs = (jnp.concatenate([zcol, h1[:, :W - 1, :]], axis=1),   # kx = 0
             h1,                                                  # kx = 1
             jnp.concatenate([h1[:, 1:, :], zcol], axis=1))       # kx = 2

    # ---- conv2 (3x3, stride 1, pad 1): 9 accumulated matmuls (no im2col) ----
    acc = jnp.zeros((M, Pp), jnp.float32)
    for ky in range(3):
        for kx in range(3):
            a = slabs[kx][ky:ky + TH].reshape(M, Pp)
            acc = acc + jnp.dot(a, w2_ref[3 * ky + kx],
                                preferred_element_type=jnp.float32)
    h2 = jnp.maximum(acc + b2_ref[...], 0.0).astype(w3_ref.dtype)

    # ---- conv3 (1x1), residual add, fused (bn3 + bn_sc) bias, final ReLU ----
    h3 = jnp.dot(h2, w3_ref[...], preferred_element_type=jnp.float32)
    out = jnp.maximum(h3 + sc + b3sc_ref[...], 0.0)
    o_ref[...] = out.reshape(1, TH, W, Pp).astype(o_ref.dtype)


def _round_up(v, m):
    return -(-v // m) * m


def _pad_to(a, shape):
    return jnp.pad(a, [(0, t - s) for s, t in zip(a.shape, shape)])


def bottleneck_pallas_nhwc(x_nhwc, p, *, row_block=None,
                           compute_dtype=jnp.bfloat16):
    """Hot-path entry: NHWC activations, channel dim padded to LANE on output.

    In a full network this NHWC / lane-padded bf16 layout should be the
    persistent inter-layer layout (no NCHW transposes in the hot path).
    """
    N, H, W, Cin = x_nhwc.shape
    P = p["w1"].shape[1]
    Cp = _round_up(Cin, LANE)
    Pp = _round_up(P, LANE)

    # TODO(synk): pad + mask W when it is not a multiple of 8 (late ResNet
    # stages have W == 7); keeps (N,H,W,C)->(M,C) reshapes free relayouts.
    assert W % SUBLANE == 0, "W must be a multiple of 8 sublanes"

    if row_block is None:
        row_block = H
    assert H % row_block == 0, "H must be divisible by row_block"
    TH = row_block
    nT = H // TH

    # ---- parameter prep (runs once on tiny tensors) -------------------------
    # Fold BN scale into conv weights (scale acts on output channels), pad
    # channel dims to the lane width, cast MXU operands to bf16.
    w1 = _pad_to(p["w1"] * p["s1"], (Cp, Pp))
    wsc = _pad_to(p["wsc"] * p["ssc"], (Cp, Pp))
    w1sc = jnp.concatenate([w1, wsc], axis=1).astype(compute_dtype)  # (Cp, 2Pp)
    w2 = _pad_to(p["w2"] * p["s2"].reshape(1, 1, 1, P), (3, 3, Pp, Pp))
    w2 = w2.reshape(9, Pp, Pp).astype(compute_dtype)
    w3 = _pad_to(p["w3"] * p["s3"], (Pp, Pp)).astype(compute_dtype)
    b1 = _pad_to(p["b1"], (1, Pp)).astype(jnp.float32)
    b2 = _pad_to(p["b2"], (1, Pp)).astype(jnp.float32)
    b3sc = _pad_to(p["b3"] + p["bsc"], (1, Pp)).astype(jnp.float32)  # fold bn_sc bias

    # ---- activations: channel pad, 1-row halo, overlapping row tiles --------
    # TODO(synk): at real ResNet sizes fetch the row halo with a manual DMA
    # (memory_space=pl.ANY + make_async_copy) instead of materializing
    # overlapping tiles in HBM.
    x = _pad_to(x_nhwc, (N, H, W, Cp)).astype(compute_dtype)
    xh = jnp.pad(x, ((0, 0), (1, 1), (0, 0), (0, 0)))
    x_tiles = jnp.stack([xh[:, t * TH:t * TH + TH + 2] for t in range(nT)],
                        axis=1)                              # (N, nT, TH+2, W, Cp)

    # ---- VMEM budget (sized against v7x's 64 MiB as the floor) --------------
    bytes_in = (TH + 2) * W * Cp * 2
    bytes_out = TH * W * Pp * 2
    bytes_w = (Cp * 2 * Pp + 10 * Pp * Pp) * 2 + 3 * Pp * 4
    bytes_live = ((TH + 2) * W * 2 * Pp * 4          # h1sc f32
                  + 3 * (TH + 2) * W * Pp * 2        # bf16 shifted slabs
                  + 3 * TH * W * Pp * 4)             # acc / h2 / sc f32
    est = 2 * (bytes_in + bytes_out) + bytes_w + bytes_live
    vmem_limit = int(min(48 * 2 ** 20, max(32 * 2 ** 20, 2 * est)))

    def const_spec(shape):
        nd = len(shape)
        return pl.BlockSpec(shape, lambda n, t, _nd=nd: (0,) * _nd)

    out_nhwc = pl.pallas_call(
        _bottleneck_kernel,
        out_shape=jax.ShapeDtypeStruct((N, H, W, Pp), compute_dtype),
        grid_spec=pltpu.PrefetchScalarGridSpec(
            num_scalar_prefetch=0,
            grid=(N, nT),
            in_specs=[
                pl.BlockSpec((1, 1, TH + 2, W, Cp),
                             lambda n, t: (n, t, 0, 0, 0)),
                const_spec((Cp, 2 * Pp)), const_spec((1, Pp)),
                const_spec((9, Pp, Pp)), const_spec((1, Pp)),
                const_spec((Pp, Pp)), const_spec((1, Pp)),
            ],
            out_specs=pl.BlockSpec((1, TH, W, Pp), lambda n, t: (n, t, 0, 0)),
        ),
        compiler_params=pltpu.CompilerParams(
            dimension_semantics=("parallel", "parallel"),
            vmem_limit_bytes=vmem_limit),
    )(x_tiles, w1sc, b1, w2, b2, w3, b3sc)

    return out_nhwc     # (N, H, W, Pp) bf16, lane-padded channels


def bottleneck_pallas(x_nchw, p, **kw):
    """NCHW-in / NCHW-out convenience wrapper matching the PyTorch module.

    In a full network keep the NHWC lane-padded layout between layers and
    call bottleneck_pallas_nhwc directly; these transposes are test glue only.
    """
    P = p["w1"].shape[1]
    x = jnp.transpose(x_nchw, (0, 2, 3, 1))
    out = bottleneck_pallas_nhwc(x, p, **kw)
    return jnp.transpose(out[..., :P], (0, 3, 1, 2)).astype(jnp.float32)


def bottleneck_ref(x_nchw, p):
    """Pure-JAX reference (f32, highest precision) for correctness checking."""
    x = jnp.transpose(x_nchw, (0, 2, 3, 1))
    dn = ("NHWC", "HWIO", "NHWC")
    prec = lax.Precision.HIGHEST
    Cin = x.shape[-1]
    P = p["w1"].shape[1]

    def conv(v, w, pad):
        return lax.conv_general_dilated(v, w, window_strides=(1, 1),
                                        padding=pad, dimension_numbers=dn,
                                        precision=prec)

    h = conv(x, p["w1"].reshape(1, 1, Cin, P), "VALID") * p["s1"] + p["b1"]
    h = jnp.maximum(h, 0.0)
    h = conv(h, p["w2"], "SAME") * p["s2"] + p["b2"]
    h = jnp.maximum(h, 0.0)
    h = conv(h, p["w3"].reshape(1, 1, P, P), "VALID") * p["s3"] + p["b3"]
    sc = conv(x, p["wsc"].reshape(1, 1, Cin, P), "VALID") * p["ssc"] + p["bsc"]
    out = jnp.maximum(h + sc, 0.0)
    return jnp.transpose(out, (0, 3, 1, 2))


def _fold_bn(kg, kb, km, kv, c, eps=1e-5):
    gamma = 1.0 + 0.1 * jax.random.normal(kg, (c,), jnp.float32)
    beta = 0.1 * jax.random.normal(kb, (c,), jnp.float32)
    mean = 0.1 * jax.random.normal(km, (c,), jnp.float32)
    var = jax.random.uniform(kv, (c,), jnp.float32, minval=0.5, maxval=1.5)
    scale = gamma / jnp.sqrt(var + eps)
    bias = beta - mean * scale
    return scale.reshape(1, c), bias.reshape(1, c)


if __name__ == "__main__":
    key = jax.random.PRNGKey(0)
    N, Cin, H, W = 2, 4, 16, 16
    planes = 8                     # in_planes != expansion*planes -> real shortcut
    ks = jax.random.split(key, 21)

    # Conv weights (bias=False in the module). Stored as (Cin, Cout) for the
    # 1x1 convs and (kh, kw, Cin, Cout) for the 3x3 conv.
    w1 = 0.3 * jax.random.normal(ks[0], (Cin, planes), jnp.float32)
    w2 = 0.1 * jax.random.normal(ks[1], (3, 3, planes, planes), jnp.float32)
    w3 = 0.3 * jax.random.normal(ks[2], (planes, planes), jnp.float32)
    wsc = 0.3 * jax.random.normal(ks[3], (Cin, planes), jnp.float32)

    s1, b1 = _fold_bn(ks[4], ks[5], ks[6], ks[7], planes)
    s2, b2 = _fold_bn(ks[8], ks[9], ks[10], ks[11], planes)
    s3, b3 = _fold_bn(ks[12], ks[13], ks[14], ks[15], planes)
    ssc, bsc = _fold_bn(ks[16], ks[17], ks[18], ks[19], planes)

    params = dict(w1=w1, s1=s1, b1=b1, w2=w2, s2=s2, b2=b2,
                  w3=w3, s3=s3, b3=b3, wsc=wsc, ssc=ssc, bsc=bsc)

    x = jax.random.normal(ks[20], (N, Cin, H, W), jnp.float32)

    # row_block=8 -> grid (N=2, nT=2): exercises the batch/row-tile pipeline.
    out = jax.block_until_ready(bottleneck_pallas(x, params, row_block=8))
    ref = jax.block_until_ready(bottleneck_ref(x, params))

    assert out.shape == (N, planes, H, W), out.shape
    # bf16 MXU inputs + bf16 output (f32 accumulation) -> relaxed tolerance vs
    # the full-f32 reference.
    assert jnp.allclose(out, ref, atol=2e-2, rtol=2e-2), float(
        jnp.max(jnp.abs(out - ref)))

    print("KERNEL_OK")
</pallas_src>

<mosaic_0001>
module attributes {stable_mosaic.version = 11 : i64} {
  func.func @_bottleneck_kernel(%arg0: i32, %arg1: i32, %arg2: memref<1x1x10x16x128xbf16, #tpu.memory_space<vmem>>, %arg3: memref<128x256xbf16, #tpu.memory_space<vmem>>, %arg4: memref<1x128xf32, #tpu.memory_space<vmem>>, %arg5: memref<9x128x128xbf16, #tpu.memory_space<vmem>>, %arg6: memref<1x128xf32, #tpu.memory_space<vmem>>, %arg7: memref<128x128xbf16, #tpu.memory_space<vmem>>, %arg8: memref<1x128xf32, #tpu.memory_space<vmem>>, %arg9: memref<1x8x16x128xbf16, #tpu.memory_space<vmem>>) attributes {dimension_semantics = [#tpu.dimension_semantics<parallel>, #tpu.dimension_semantics<parallel>], iteration_bounds = array<i64: 2, 2>, scalar_prefetch = 0 : i64, scratch_operands = 0 : i64, tpu.core_type = #tpu.core_type<tc>, window_params = [{transform_indices = @transform_0, window_bounds = array<i64: 1, 1, 10, 16, 128>}, {pipeline_mode = #tpu.pipeline_mode<synchronous>, transform_indices = @transform_1, window_bounds = array<i64: 128, 256>}, {pipeline_mode = #tpu.pipeline_mode<synchronous>, transform_indices = @transform_2, window_bounds = array<i64: 1, 128>}, {pipeline_mode = #tpu.pipeline_mode<synchronous>, transform_indices = @transform_3, window_bounds = array<i64: 9, 128, 128>}, {pipeline_mode = #tpu.pipeline_mode<synchronous>, transform_indices = @transform_4, window_bounds = array<i64: 1, 128>}, {pipeline_mode = #tpu.pipeline_mode<synchronous>, transform_indices = @transform_5, window_bounds = array<i64: 128, 128>}, {pipeline_mode = #tpu.pipeline_mode<synchronous>, transform_indices = @transform_6, window_bounds = array<i64: 1, 128>}, {transform_indices = @transform_7, window_bounds = array<i64: 1, 8, 16, 128>}]} {
    %c0 = arith.constant 0 : index
    %c0_0 = arith.constant 0 : index
    %c0_1 = arith.constant 0 : index
    %c0_2 = arith.constant 0 : index
    %c0_3 = arith.constant 0 : index
    %0 = vector.load %arg2[%c0, %c0_0, %c0_1, %c0_2, %c0_3] : memref<1x1x10x16x128xbf16, #tpu.memory_space<vmem>>, vector<1x1x10x16x128xbf16>
    %1 = vector.shape_cast %0 : vector<1x1x10x16x128xbf16> to vector<160x128xbf16>
    %c0_4 = arith.constant 0 : index
    %c0_5 = arith.constant 0 : index
    %2 = vector.load %arg3[%c0_4, %c0_5] : memref<128x256xbf16, #tpu.memory_space<vmem>>, vector<128x256xbf16>
    %cst = arith.constant dense<0.000000e+00> : vector<160x256xf32>
    %3 = tpu.matmul %1, %2, %cst {dimension_numbers = #tpu.dot_dimension_numbers<[1], [0], [0], [1], [0, 0, 1, 1], [], []>} : vector<160x128xbf16>, vector<128x256xbf16>, vector<160x256xf32> -> vector<160x256xf32>
    %4 = vector.shape_cast %3 : vector<160x256xf32> to vector<10x16x256xf32>
    %5 = vector.extract_strided_slice %4 {offsets = [0, 0, 0], sizes = [10, 16, 128], strides = [1, 1, 1]} : vector<10x16x256xf32> to vector<10x16x128xf32>
    %c0_6 = arith.constant 0 : index
    %c0_7 = arith.constant 0 : index
    %6 = vector.load %arg4[%c0_6, %c0_7] : memref<1x128xf32, #tpu.memory_space<vmem>>, vector<1x128xf32>
    %7 = vector.shape_cast %6 : vector<1x128xf32> to vector<1x1x128xf32>
    %8 = vector.broadcast %7 : vector<1x1x128xf32> to vector<10x16x128xf32>
    %9 = arith.addf %5, %8 : vector<10x16x128xf32>
    %cst_8 = arith.constant 0.000000e+00 : f32
    %10 = vector.broadcast %cst_8 : f32 to vector<10x16x128xf32>
    %11 = arith.maximumf %9, %10 : vector<10x16x128xf32>
    %12 = arith.truncf %11 : vector<10x16x128xf32> to vector<10x16x128xbf16>
    %13 = vector.extract_strided_slice %4 {offsets = [1, 0, 128], sizes = [8, 16, 128], strides = [1, 1, 1]} : vector<10x16x256xf32> to vector<8x16x128xf32>
    %14 = vector.shape_cast %13 : vector<8x16x128xf32> to vector<128x128xf32>
    %15 = tpu.iota {dimensions = array<i32: 0>} : vector<10x16x128xi32>
    %c0_i32 = arith.constant 0 : i32
    %16 = vector.broadcast %c0_i32 : i32 to vector<10x16x128xi32>
    %17 = arith.cmpi eq, %15, %16 : vector<10x16x128xi32>
    %c0_i32_9 = arith.constant 0 : i32
    %18 = arith.cmpi eq, %arg1, %c0_i32_9 : i32
    %19 = vector.broadcast %18 : i1 to vector<10x16x128xi1>
    %20 = arith.andi %17, %19 : vector<10x16x128xi1>
    %c9_i32 = arith.constant 9 : i32
    %21 = vector.broadcast %c9_i32 : i32 to vector<10x16x128xi32>
    %22 = arith.cmpi eq, %15, %21 : vector<10x16x128xi32>
    %c1_i32 = arith.constant 1 : i32
    %23 = arith.cmpi eq, %arg1, %c1_i32 : i32
    %24 = vector.broadcast %23 : i1 to vector<10x16x128xi1>
    %25 = arith.andi %22, %24 : vector<10x16x128xi1>
    %26 = arith.ori %20, %25 : vector<10x16x128xi1>
    %cst_10 = arith.constant 0.000000e+00 : bf16
    %27 = vector.broadcast %cst_10 : bf16 to vector<10x16x128xbf16>
    %28 = arith.select %26, %27, %12 : vector<10x16x128xi1>, vector<10x16x128xbf16>
    %cst_11 = arith.constant 0.000000e+00 : bf16
    %29 = vector.broadcast %cst_11 : bf16 to vector<10x1x128xbf16>
    %30 = vector.extract_strided_slice %28 {offsets = [0, 0, 0], sizes = [10, 15, 128], strides = [1, 1, 1]} : vector<10x16x128xbf16> to vector<10x15x128xbf16>
    %31 = tpu.concatenate %29, %30 in 1 : vector<10x1x128xbf16>, vector<10x15x128xbf16> -> vector<10x16x128xbf16>
    %32 = vector.extract_strided_slice %28 {offsets = [0, 1, 0], sizes = [10, 15, 128], strides = [1, 1, 1]} : vector<10x16x128xbf16> to vector<10x15x128xbf16>
    %33 = tpu.concatenate %32, %29 in 1 : vector<10x15x128xbf16>, vector<10x1x128xbf16> -> vector<10x16x128xbf16>
    %cst_12 = arith.constant 0.000000e+00 : f32
    %34 = vector.broadcast %cst_12 : f32 to vector<128x128xf32>
    %35 = vector.extract_strided_slice %31 {offsets = [0, 0, 0], sizes = [8, 16, 128], strides = [1, 1, 1]} : vector<10x16x128xbf16> to vector<8x16x128xbf16>
    %36 = vector.shape_cast %35 : vector<8x16x128xbf16> to vector<128x128xbf16>
    %c0_13 = arith.constant 0 : index
    %c0_14 = arith.constant 0 : index
    %c0_15 = arith.constant 0 : index
    %37 = vector.load %arg5[%c0_13, %c0_14, %c0_15] : memref<9x128x128xbf16, #tpu.memory_space<vmem>>, vector<1x128x128xbf16>
    %38 = vector.shape_cast %37 : vector<1x128x128xbf16> to vector<128x128xbf16>
    %cst_16 = arith.constant dense<0.000000e+00> : vector<128x128xf32>
    %39 = tpu.matmul %36, %38, %cst_16 {dimension_numbers = #tpu.dot_dimension_numbers<[1], [0], [0], [1], [0, 0, 1, 1], [], []>} : vector<128x128xbf16>, vector<128x128xbf16>, vector<128x128xf32> -> vector<128x128xf32>
    %40 = arith.addf %34, %39 : vector<128x128xf32>
    %41 = vector.extract_strided_slice %28 {offsets = [0, 0, 0], sizes = [8, 16, 128], strides = [1, 1, 1]} : vector<10x16x128xbf16> to vector<8x16x128xbf16>
    %42 = vector.shape_cast %41 : vector<8x16x128xbf16> to vector<128x128xbf16>
    %c1 = arith.constant 1 : index
    %c0_17 = arith.constant 0 : index
    %c0_18 = arith.constant 0 : index
    %43 = vector.load %arg5[%c1, %c0_17, %c0_18] : memref<9x128x128xbf16, #tpu.memory_space<vmem>>, vector<1x128x128xbf16>
    %44 = vector.shape_cast %43 : vector<1x128x128xbf16> to vector<128x128xbf16>
    %cst_19 = arith.constant dense<0.000000e+00> : vector<128x128xf32>
    %45 = tpu.matmul %42, %44, %cst_19 {dimension_numbers = #tpu.dot_dimension_numbers<[1], [0], [0], [1], [0, 0, 1, 1], [], []>} : vector<128x128xbf16>, vector<128x128xbf16>, vector<128x128xf32> -> vector<128x128xf32>
    %46 = arith.addf %40, %45 : vector<128x128xf32>
    %47 = vector.extract_strided_slice %33 {offsets = [0, 0, 0], sizes = [8, 16, 128], strides = [1, 1, 1]} : vector<10x16x128xbf16> to vector<8x16x128xbf16>
    %48 = vector.shape_cast %47 : vector<8x16x128xbf16> to vector<128x128xbf16>
    %c2 = arith.constant 2 : index
    %c0_20 = arith.constant 0 : index
    %c0_21 = arith.constant 0 : index
    %49 = vector.load %arg5[%c2, %c0_20, %c0_21] : memref<9x128x128xbf16, #tpu.memory_space<vmem>>, vector<1x128x128xbf16>
    %50 = vector.shape_cast %49 : vector<1x128x128xbf16> to vector<128x128xbf16>
    %cst_22 = arith.constant dense<0.000000e+00> : vector<128x128xf32>
    %51 = tpu.matmul %48, %50, %cst_22 {dimension_numbers = #tpu.dot_dimension_numbers<[1], [0], [0], [1], [0, 0, 1, 1], [], []>} : vector<128x128xbf16>, vector<128x128xbf16>, vector<128x128xf32> -> vector<128x128xf32>
    %52 = arith.addf %46, %51 : vector<128x128xf32>
    %53 = vector.extract_strided_slice %31 {offsets = [1, 0, 0], sizes = [8, 16, 128], strides = [1, 1, 1]} : vector<10x16x128xbf16> to vector<8x16x128xbf16>
    %54 = vector.shape_cast %53 : vector<8x16x128xbf16> to vector<128x128xbf16>
    %c3 = arith.constant 3 : index
    %c0_23 = arith.constant 0 : index
    %c0_24 = arith.constant 0 : index
    %55 = vector.load %arg5[%c3, %c0_23, %c0_24] : memref<9x128x128xbf16, #tpu.memory_space<vmem>>, vector<1x128x128xbf16>
    %56 = vector.shape_cast %55 : vector<1x128x128xbf16> to vector<128x128xbf16>
    %cst_25 = arith.constant dense<0.000000e+00> : vector<128x128xf32>
    %57 = tpu.matmul %54, %56, %cst_25 {dimension_numbers = #tpu.dot_dimension_numbers<[1], [0], [0], [1], [0, 0, 1, 1], [], []>} : vector<128x128xbf16>, vector<128x128xbf16>, vector<128x128xf32> -> vector<128x128xf32>
    %58 = arith.addf %52, %57 : vector<128x128xf32>
    %59 = vector.extract_strided_slice %28 {offsets = [1, 0, 0], sizes = [8, 16, 128], strides = [1, 1, 1]} : vector<10x16x128xbf16> to vector<8x16x128xbf16>
    %60 = vector.shape_cast %59 : vector<8x16x128xbf16> to vector<128x128xbf16>
    %c4 = arith.constant 4 : index
    %c0_26 = arith.constant 0 : index
    %c0_27 = arith.constant 0 : index
    %61 = vector.load %arg5[%c4, %c0_26, %c0_27] : memref<9x128x128xbf16, #tpu.memory_space<vmem>>, vector<1x128x128xbf16>
    %62 = vector.shape_cast %61 : vector<1x128x128xbf16> to vector<128x128xbf16>
    %cst_28 = arith.constant dense<0.000000e+00> : vector<128x128xf32>
    %63 = tpu.matmul %60, %62, %cst_28 {dimension_numbers = #tpu.dot_dimension_numbers<[1], [0], [0], [1], [0, 0, 1, 1], [], []>} : vector<128x128xbf16>, vector<128x128xbf16>, vector<128x128xf32> -> vector<128x128xf32>
    %64 = arith.addf %58, %63 : vector<128x128xf32>
    %65 = vector.extract_strided_slice %33 {offsets = [1, 0, 0], sizes = [8, 16, 128], strides = [1, 1, 1]} : vector<10x16x128xbf16> to vector<8x16x128xbf16>
    %66 = vector.shape_cast %65 : vector<8x16x128xbf16> to vector<128x128xbf16>
    %c5 = arith.constant 5 : index
    %c0_29 = arith.constant 0 : index
    %c0_30 = arith.constant 0 : index
    %67 = vector.load %arg5[%c5, %c0_29, %c0_30] : memref<9x128x128xbf16, #tpu.memory_space<vmem>>, vector<1x128x128xbf16>
    %68 = vector.shape_cast %67 : vector<1x128x128xbf16> to vector<128x128xbf16>
    %cst_31 = arith.constant dense<0.000000e+00> : vector<128x128xf32>
    %69 = tpu.matmul %66, %68, %cst_31 {dimension_numbers = #tpu.dot_dimension_numbers<[1], [0], [0], [1], [0, 0, 1, 1], [], []>} : vector<128x128xbf16>, vector<128x128xbf16>, vector<128x128xf32> -> vector<128x128xf32>
    %70 = arith.addf %64, %69 : vector<128x128xf32>
    %71 = vector.extract_strided_slice %31 {offsets = [2, 0, 0], sizes = [8, 16, 128], strides = [1, 1, 1]} : vector<10x16x128xbf16> to vector<8x16x128xbf16>
    %72 = vector.shape_cast %71 : vector<8x16x128xbf16> to vector<128x128xbf16>
    %c6 = arith.constant 6 : index
    %c0_32 = arith.constant 0 : index
    %c0_33 = arith.constant 0 : index
    %73 = vector.load %arg5[%c6, %c0_32, %c0_33] : memref<9x128x128xbf16, #tpu.memory_space<vmem>>, vector<1x128x128xbf16>
    %74 = vector.shape_cast %73 : vector<1x128x128xbf16> to vector<128x128xbf16>
    %cst_34 = arith.constant dense<0.000000e+00> : vector<128x128xf32>
    %75 = tpu.matmul %72, %74, %cst_34 {dimension_numbers = #tpu.dot_dimension_numbers<[1], [0], [0], [1], [0, 0, 1, 1], [], []>} : vector<128x128xbf16>, vector<128x128xbf16>, vector<128x128xf32> -> vector<128x128xf32>
    %76 = arith.addf %70, %75 : vector<128x128xf32>
    %77 = vector.extract_strided_slice %28 {offsets = [2, 0, 0], sizes = [8, 16, 128], strides = [1, 1, 1]} : vector<10x16x128xbf16> to vector<8x16x128xbf16>
    %78 = vector.shape_cast %77 : vector<8x16x128xbf16> to vector<128x128xbf16>
    %c7 = arith.constant 7 : index
    %c0_35 = arith.constant 0 : index
    %c0_36 = arith.constant 0 : index
    %79 = vector.load %arg5[%c7, %c0_35, %c0_36] : memref<9x128x128xbf16, #tpu.memory_space<vmem>>, vector<1x128x128xbf16>
    %80 = vector.shape_cast %79 : vector<1x128x128xbf16> to vector<128x128xbf16>
    %cst_37 = arith.constant dense<0.000000e+00> : vector<128x128xf32>
    %81 = tpu.matmul %78, %80, %cst_37 {dimension_numbers = #tpu.dot_dimension_numbers<[1], [0], [0], [1], [0, 0, 1, 1], [], []>} : vector<128x128xbf16>, vector<128x128xbf16>, vector<128x128xf32> -> vector<128x128xf32>
    %82 = arith.addf %76, %81 : vector<128x128xf32>
    %83 = vector.extract_strided_slice %33 {offsets = [2, 0, 0], sizes = [8, 16, 128], strides = [1, 1, 1]} : vector<10x16x128xbf16> to vector<8x16x128xbf16>
    %84 = vector.shape_cast %83 : vector<8x16x128xbf16> to vector<128x128xbf16>
    %c8 = arith.constant 8 : index
    %c0_38 = arith.constant 0 : index
    %c0_39 = arith.constant 0 : index
    %85 = vector.load %arg5[%c8, %c0_38, %c0_39] : memref<9x128x128xbf16, #tpu.memory_space<vmem>>, vector<1x128x128xbf16>
    %86 = vector.shape_cast %85 : vector<1x128x128xbf16> to vector<128x128xbf16>
    %cst_40 = arith.constant dense<0.000000e+00> : vector<128x128xf32>
    %87 = tpu.matmul %84, %86, %cst_40 {dimension_numbers = #tpu.dot_dimension_numbers<[1], [0], [0], [1], [0, 0, 1, 1], [], []>} : vector<128x128xbf16>, vector<128x128xbf16>, vector<128x128xf32> -> vector<128x128xf32>
    %88 = arith.addf %82, %87 : vector<128x128xf32>
    %c0_41 = arith.constant 0 : index
    %c0_42 = arith.constant 0 : index
    %89 = vector.load %arg6[%c0_41, %c0_42] : memref<1x128xf32, #tpu.memory_space<vmem>>, vector<1x128xf32>
    %90 = vector.broadcast %89 : vector<1x128xf32> to vector<128x128xf32>
    %91 = arith.addf %88, %90 : vector<128x128xf32>
    %cst_43 = arith.constant 0.000000e+00 : f32
    %92 = vector.broadcast %cst_43 : f32 to vector<128x128xf32>
    %93 = arith.maximumf %91, %92 : vector<128x128xf32>
    %94 = arith.truncf %93 : vector<128x128xf32> to vector<128x128xbf16>
    %c0_44 = arith.constant 0 : index
    %c0_45 = arith.constant 0 : index
    %95 = vector.load %arg7[%c0_44, %c0_45] : memref<128x128xbf16, #tpu.memory_space<vmem>>, vector<128x128xbf16>
    %cst_46 = arith.constant dense<0.000000e+00> : vector<128x128xf32>
    %96 = tpu.matmul %94, %95, %cst_46 {dimension_numbers = #tpu.dot_dimension_numbers<[1], [0], [0], [1], [0, 0, 1, 1], [], []>} : vector<128x128xbf16>, vector<128x128xbf16>, vector<128x128xf32> -> vector<128x128xf32>
    %97 = arith.addf %96, %14 : vector<128x128xf32>
    %c0_47 = arith.constant 0 : index
    %c0_48 = arith.constant 0 : index
    %98 = vector.load %arg8[%c0_47, %c0_48] : memref<1x128xf32, #tpu.memory_space<vmem>>, vector<1x128xf32>
    %99 = vector.broadcast %98 : vector<1x128xf32> to vector<128x128xf32>
    %100 = arith.addf %97, %99 : vector<128x128xf32>
    %cst_49 = arith.constant 0.000000e+00 : f32
    %101 = vector.broadcast %cst_49 : f32 to vector<128x128xf32>
    %102 = arith.maximumf %100, %101 : vector<128x128xf32>
    %103 = vector.shape_cast %102 : vector<128x128xf32> to vector<1x8x16x128xf32>
    %104 = arith.truncf %103 : vector<1x8x16x128xf32> to vector<1x8x16x128xbf16>
    %c0_50 = arith.constant 0 : index
    %c0_51 = arith.constant 0 : index
    %c0_52 = arith.constant 0 : index
    %c0_53 = arith.constant 0 : index
    %105 = vector.load %arg9[%c0_50, %c0_51, %c0_52, %c0_53] : memref<1x8x16x128xbf16, #tpu.memory_space<vmem>>, vector<1x8x16x128xbf16>
    tpu.vector_store %arg9[%c0_50, %c0_51, %c0_52, %c0_53], %104 {strides = array<i32>} : memref<1x8x16x128xbf16, #tpu.memory_space<vmem>>, vector<1x8x16x128xbf16>,
    return
  }
  func.func @transform_0(%arg0: i32, %arg1: i32) -> (i32, i32, i32, i32, i32) {
    %c0_i32 = arith.constant 0 : i32
    %c0_i32_0 = arith.constant 0 : i32
    %c0_i32_1 = arith.constant 0 : i32
    %c0_i32_2 = arith.constant 0 : i32
    return %arg0, %arg1, %c0_i32, %c0_i32_0, %c0_i32_1 : i32, i32, i32, i32, i32
  }
  func.func @transform_1(%arg0: i32, %arg1: i32) -> (i32, i32) {
    %c0_i32 = arith.constant 0 : i32
    %c0_i32_0 = arith.constant 0 : i32
    %c0_i32_1 = arith.constant 0 : i32
    return %c0_i32, %c0_i32_0 : i32, i32
  }
  func.func @transform_2(%arg0: i32, %arg1: i32) -> (i32, i32) {
    %c0_i32 = arith.constant 0 : i32
    %c0_i32_0 = arith.constant 0 : i32
    %c0_i32_1 = arith.constant 0 : i32
    return %c0_i32, %c0_i32_0 : i32, i32
  }
  func.func @transform_3(%arg0: i32, %arg1: i32) -> (i32, i32, i32) {
    %c0_i32 = arith.constant 0 : i32
    %c0_i32_0 = arith.constant 0 : i32
    %c0_i32_1 = arith.constant 0 : i32
    %c0_i32_2 = arith.constant 0 : i32
    return %c0_i32, %c0_i32_0, %c0_i32_1 : i32, i32, i32
  }
  func.func @transform_4(%arg0: i32, %arg1: i32) -> (i32, i32) {
    %c0_i32 = arith.constant 0 : i32
    %c0_i32_0 = arith.constant 0 : i32
    %c0_i32_1 = arith.constant 0 : i32
    return %c0_i32, %c0_i32_0 : i32, i32
  }
  func.func @transform_5(%arg0: i32, %arg1: i32) -> (i32, i32) {
    %c0_i32 = arith.constant 0 : i32
    %c0_i32_0 = arith.constant 0 : i32
    %c0_i32_1 = arith.constant 0 : i32
    return %c0_i32, %c0_i32_0 : i32, i32
  }
  func.func @transform_6(%arg0: i32, %arg1: i32) -> (i32, i32) {
    %c0_i32 = arith.constant 0 : i32
    %c0_i32_0 = arith.constant 0 : i32
    %c0_i32_1 = arith.constant 0 : i32
    return %c0_i32, %c0_i32_0 : i32, i32
  }
  func.func @transform_7(%arg0: i32, %arg1: i32) -> (i32, i32, i32, i32) {
    %c0_i32 = arith.constant 0 : i32
    %c0_i32_0 = arith.constant 0 : i32
    %c0_i32_1 = arith.constant 0 : i32
    return %arg0, %arg1, %c0_i32, %c0_i32_0 : i32, i32, i32, i32
  }
}

</mosaic_0001>

<bundles_post_ra>
// kernel: tpu_custom_call.1
= control target key start
LH: loop header
LB: loop body
LE: loop exit
PB: predicated region body
PF: predicated region fallthrough
CT: control target
= control target key end

     0   :  { %s4989_s0 = inlined_call_operand.hbm [shape: bf16[2,2,10,16,128], index: 0, kind: input, shape index: {}]   ;;  %s4990_s1 = inlined_call_operand.hbm [shape: bf16[128,256], index: 1, kind: input, shape index: {}]   ;;  %s4991_s2 = inlined_call_operand.vmem [shape: f32[1,128], index: 2, kind: input, shape index: {}]   ;;  %s4992_s3 = inlined_call_operand.hbm [shape: bf16[9,128,128], index: 3, kind: input, shape index: {}]   ;;  %s4993_s4 = inlined_call_operand.vmem [shape: f32[1,128], index: 4, kind: input, shape index: {}]   ;;  %s4994_s5 = inlined_call_operand.hbm [shape: bf16[128,128], index: 5, kind: input, shape index: {}]   ;;  %s4995_s6 = inlined_call_operand.vmem [shape: f32[1,128], index: 6, kind: input, shape index: {}]   ;;  %s4996_s7 = inlined_call_operand.hbm [shape: bf16[2,16,16,128], index: 7, kind: output, shape index: {}]  }
   0x1   :  { %5006 = sst [smem:[#allocation18_spill]] %s4990_s1 }
   0x2   :  { %5007 = sst [smem:[#allocation19_spill]] %s4992_s3 }
   0x3   :  { %5008 = sst [smem:[#allocation20_spill]] %s4994_s5 }
   0x4   :  { %5009 = sst [smem:[#allocation21_spill]] %s4995_s6 }
   0x5   :  { %5010 = sst [smem:[#allocation22_spill]] %s4996_s7 }
   0x6   :  { %12 = vsyncpa [#allocation3], 0 }
   0x7   :  { %14 = vsyncpa [#allocation3 + $0x1], 0 }
   0x8   :  { %15 = vsyncpa [#allocation6], 0 }
   0x9   :  { %16 = vsyncpa [#allocation9], 0 }
   0xa   :  { %17 = vsyncpa [#allocation4], 0 }
   0xb   :  { %19 = vsyncpa [#allocation4 + $0x1], 0  ;;  %s4254_s24 = smov 0   ;;  %s4256_s25 = smov 0  }
   0xc   :  { %s4258_s26 = smov 0   ;;  %s4260_s27 = smov 0  }
   0xd   :  { %s4262_s28 = smov 0   ;;  %s4264_s29 = smov 0  }
   0xe   :  { %s4266_s30 = smov 0   ;;  %s4268_s8 = smov 0  }
   0xf LB: > { %5011 = sst [smem:[#allocation15_spill]] %s4172_s24  ;;  %s2909_s9 = sadd.s32 4294967295, %s4200_s8   ;;  %s4200_s8 = sphi %s4268_s8, %s25_s8   ;;  %s4196_s30 = sphi %s4266_s30, %s5052_s30   ;;  %s4192_s29 = sphi %s4264_s29, %s5051_s29   ;;  %s4188_s28 = sphi %s4262_s28, %s5050_s28   ;;  %s4184_s27 = sphi %s4260_s27, %s5049_s27   ;;  %s4180_s26 = sphi %s4258_s26, %s5048_s26   ;;  %s4176_s25 = sphi %s4256_s25, %s5047_s25   ;;  %s4172_s24 = sphi %s4254_s24, %s5046_s24  }
  0x10   : > { %5012 = sst [smem:[#allocation16_spill]] %s4188_s28  ;;  %s2910_s10 = sadd.s32 4294967294, %s4200_s8  }
  0x11   : > { %p59_p0 = scmp.ne.s32.totalorder %s4176_s25, %s4172_s24  ;;  %p4298_p1 = scmp.eq.s32.totalorder %s2909_s9, 0 }
  0x12   : > { %p4302_p2 = scmp.eq.s32.totalorder %s2909_s9, 3  ;;  %p217_p3 = scmp.eq.s32.totalorder %s2910_s10, 3 }
  0x13   : > { %s5013_s11 = scalar_select %p4298_p1, 1, 0 }
  0x14   : > { %s5014_s12 = scalar_select %p4302_p2, 1, 0 }
  0x15   : > { %p4308_p4 = por %p4298_p1, %p59_p0  ;;  %p2911_p5 = scmp.ge.s32.totalorder %s4200_s8, 1 }
  0x16   : > { %p4313_p6 = por %p217_p3, %p59_p0  ;;  %p224_p7 = scmp.lt.s32.totalorder %s4200_s8, 5 }
  0x17   : > { %s5015_s13 = scalar_select %p4308_p4, 1, 0 }
  0x18   : > { %s5016_s14 = scalar_select %p4313_p6, 1, 0 }
  0x19   : > { %p4318_p8 = pnand %p2911_p5, %p224_p7  ;;  %s4202_s16 = smov [#allocation5]  }
  0x1a   : > { %5017 = sst [smem:[#allocation17_spill]] %s5016_s14  ;;  %s236_s17 = sshll.u32 %s4202_s16, 4  ;;  %s237_s17 = int_to_ptr.vmem [resolvable:$true] %s236_s17 }
  0x1b   : > { %s5018_s15 = scalar_select %p4318_p8, 1, 0 }
  0x1c   : > { %p3766_p9 = pneg %p4318_p8  ;;  %s4203_s19 = smov [#allocation7]  }
  0x1d   : > { %s252_s20 = sshll.u32 %s4203_s19, 4  ;;  %s5020_s1 = sld [smem:[#allocation18_spill]]  ;;  %s4330_s20 = int_to_ptr.vmem [resolvable:$true] %s252_s20 }
  0x1e   : > { %p4326_p10 = pnand %p3766_p9, %p4298_p1 }
  0x20   : > { %p4340_p12 = pneg %p4326_p10 }
  0x23   : > { %s3980_s23 = scalar_lea.hbm %s5020_s1, 2048 }
  0x24   : > { %p3981_p11 = scmp.ne.s32.totalorder %s5020_s1, %s3980_s23  ;;  %p3987_p3 = scmp.lt.u32.totalorder %s3980_s23, %s5020_s1 }
  0x26   : > { %p3983_p13 = pnand %p4340_p12, %p3981_p11 }
  0x28   : > { %p3984_p0 = pneg %p3983_p13 }
  0x2a   : > { %p3989_p5 = pnand %p3987_p3, %p3984_p0 }
  0x2c   : > { %3992 = shalt.err (!%p3989_p5)
}
  0x2d   : > { %s3993_s21 = scalar_lea.vmem %s237_s17, 2048  ;;  %p4001_p1 = scmp.lt.s32.totalorder %s237_s17, %s237_s17 }
  0x2e   : > { %p3994_p7 = scmp.ne.s32.totalorder %s237_s17, %s3993_s21  ;;  %p4002_p4 = scmp.lt.s32.totalorder %s3993_s21, %s3993_s21 }
  0x30   : > { %p3996_p9 = pnand %p3994_p7, %p4340_p12  ;;  %p4003_p8 = por %p4002_p4, %p4001_p1 }
  0x32   : > { %p3997_p6 = pneg %p3996_p9 }
  0x34   : > { %p4004_p2 = pnand %p4003_p8, %p3997_p6 }
  0x36   : > { %4007 = shalt.err (!%p4004_p2)
}
  0x37   : > { %s4204_s22 = smov 128   ;;  %s4205_s9 = smov 8  }
  0x38   : > { %3769 = dma.hbm_to_vmem [thread:$0]  (!%p4326_p10), %s5020_s1, 2048, %s237_s17, [#allocation6], %s4204_s22, %s4204_s22, %s4205_s9  }
  0x39   : > { %s5022_s3 = sld [smem:[#allocation19_spill]] }
  0x3f   : > { %s4008_s24 = scalar_lea.hbm %s5022_s3, 9216 }
  0x40   : > { %p4009_p11 = scmp.ne.s32.totalorder %s5022_s3, %s4008_s24  ;;  %p4015_p4 = scmp.lt.u32.totalorder %s4008_s24, %s5022_s3 }
  0x42   : > { %p4011_p1 = pnand %p4009_p11, %p4340_p12 }
  0x44   : > { %p4012_p2 = pneg %p4011_p1 }
  0x46   : > { %p4017_p6 = pnand %p4015_p4, %p4012_p2 }
  0x48   : > { %4020 = shalt.err (!%p4017_p6)
}
  0x49   : > { %s4021_s17 = scalar_lea.vmem %s4330_s20, 9216  ;;  %p4029_p3 = scmp.lt.s32.totalorder %s4330_s20, %s4330_s20 }
  0x4a   : > { %p4022_p8 = scmp.ne.s32.totalorder %s4330_s20, %s4021_s17  ;;  %p4030_p5 = scmp.lt.s32.totalorder %s4021_s17, %s4021_s17 }
  0x4c   : > { %p4024_p13 = pnand %p4022_p8, %p4340_p12  ;;  %p4031_p7 = por %p4030_p5, %p4029_p3 }
  0x4e   : > { %p4025_p0 = pneg %p4024_p13 }
  0x50   : > { %p4032_p9 = pnand %p4031_p7, %p4025_p0 }
  0x52   : > { %4035 = shalt.err (!%p4032_p9)
}
  0x53   : > { %s5004_s7 = smov 64   ;;  %s5005_s6 = smov 4  }
  0x54   : > { %3772 = dma.hbm_to_vmem [thread:$0]  (!%p4326_p10), %s5022_s3, 9216, %s4330_s20, [#allocation6], %s5004_s7, %s5004_s7, %s5005_s6  }
  0x55   : > { %s4208_s22 = smov [#allocation8]   ;;  %s5023_s5 = sld [smem:[#allocation20_spill]] }
  0x56   : > { %s268_s9 = sshll.u32 %s4208_s22, 4  ;;  %s269_s9 = int_to_ptr.vmem [resolvable:$true] %s268_s9 }
  0x5b   : > { %s4036_s10 = scalar_lea.hbm %s5023_s5, 1024 }
  0x5c   : > { %p4037_p11 = scmp.ne.s32.totalorder %s5023_s5, %s4036_s10  ;;  %p4043_p4 = scmp.lt.u32.totalorder %s4036_s10, %s5023_s5 }
  0x5e   : > { %p4039_p1 = pnand %p4037_p11, %p4340_p12 }
  0x60   : > { %p4040_p2 = pneg %p4039_p1 }
  0x62   : > { %p4045_p6 = pnand %p4043_p4, %p4040_p2 }
  0x64   : > { %4048 = shalt.err (!%p4045_p6)
}
  0x65   : > { %s4049_s20 = scalar_lea.vmem %s269_s9, 1024  ;;  %p4057_p3 = scmp.lt.s32.totalorder %s269_s9, %s269_s9 }
  0x66   : > { %p4050_p8 = scmp.ne.s32.totalorder %s269_s9, %s4049_s20  ;;  %p4058_p5 = scmp.lt.s32.totalorder %s4049_s20, %s4049_s20 }
  0x68   : > { %p4052_p13 = pnand %p4050_p8, %p4340_p12  ;;  %p4059_p7 = por %p4058_p5, %p4057_p3 }
  0x6a   : > { %p4053_p0 = pneg %p4052_p13 }
  0x6c   : > { %p4060_p9 = pnand %p4059_p7, %p4053_p0 }
  0x6e   : > { %4063 = shalt.err (!%p4060_p9)
}
  0x6f   : > { %3775 = dma.hbm_to_vmem [thread:$0]  (!%p4326_p10), %s5023_s5, 1024, %s269_s9, [#allocation9], %s5004_s7, %s5004_s7, %s5005_s6  }
  0x70   : > { %s34_s18 = sadd.s32 1, %s4192_s29  ;;  %s37_s16 = sadd.s32 1, %s4196_s30 }
  0x71   : > { %p35_p12 = scmp.ge.s32.totalorder %s34_s18, 2  ;;  %s46_s28 = sadd.s32 1, %s4180_s26 }
  0x72   : > { %p53_p11 = scmp.ne.s32.totalorder %s4180_s26, %s4176_s25  ;;  %p54_p1 = scmp.eq.s32.totalorder %s4200_s8, 0 }
  0x73   : > { %s5054_s18 = smov (%p35_p12, %s34_s18), 0  ;;  %s5056_s16 = smov (!%p35_p12, %s37_s16), %s4196_s30 }
  0x74   : > { %s42_s22 = ssub.s32 %s4192_s29, %s5054_s18  ;;  %p39_p2 = scmp.ge.s32.totalorder %s5056_s16, 2 }
  0x75   : > { %p5024_p4 = scmp.ne.s32.totalorder %s5014_s12, 0  ;;  %p55_p10 = por %p54_p1, %p53_p11 }
  0x76   : > { %p3787_p8 = scmp.lt.s32.totalorder %s4200_s8, 4  ;;  %s5058_s16 = smov (%p39_p2, %s5056_s16), 0 }
  0x77   : > { %p4416_p6 = por %p5024_p4, %p53_p11  ;;  %s285_s9 = sand.u32 1, %s4180_s26  }
  0x78   : > { %s3747_s23 = smul.u32 20, %s4192_s29  ;;  %s41_s10 = ssub.s32 %s4196_s30, %s5058_s16 }
  0x79   : > { %s43_s19 = sor.u32 %s42_s22, %s41_s10  ;;  %s3746_s21 = smul.u32 80, %s285_s9 }
  0x7a   : > { %p44_p13 = scmp.eq.s32.totalorder %s43_s19, 0  ;;  %s3748_s17 = smul.u32 40, %s4196_s30 }
  0x7b   : > { %p4428_p0 = pnand %p3787_p8, %p55_p10  ;;  %s289_s24 = scalar_lea.vmem [#allocation2], %s3746_s21 }
  0x7c   : > { %s4433_s12 = scalar_select %p44_p13, %s4180_s26, %s46_s28  }
  0x7d   : > { %s295_s1 = sadd.s32 %s3748_s17, %s3747_s23  ;;  %s298_s7 = sshll.u32 %s289_s24, 4  ;;  %s4435_s7 = int_to_ptr.vmem [resolvable:$true] %s298_s7 }
  0x7e   : > { %s2916_s6 = sshll.u32 %s295_s1, 6  ;;  %s4442_s10 = scalar_lea.sflag [#allocation3], %s285_s9 }
  0x7f   : > { %s4440_s22 = scalar_lea.hbm %s4989_s0, %s2916_s6  ;;  %p4066_p5 = pneg %p4428_p0 }
  0x80   : > { %s4064_s19 = scalar_lea.hbm %s4440_s22, 1280  ;;  %s4069_s3 = scalar_lea.hbm %s4989_s0, 5120 }
  0x81   : > { %p4065_p3 = scmp.ne.s32.totalorder %s4440_s22, %s4064_s19  ;;  %p4070_p12 = scmp.lt.u32.totalorder %s4440_s22, %s4989_s0 }
  0x82   : > { %p4071_p11 = scmp.lt.u32.totalorder %s4069_s3, %s4064_s19  ;;  %p4073_p2 = scmp.lt.u32.totalorder %s4064_s19, %s4440_s22 }
  0x83   : > { %p4067_p7 = pnand %p4066_p5, %p4065_p3 }
  0x84   : > { %p4072_p1 = por %p4071_p11, %p4070_p12 }
  0x85   : > { %p4068_p9 = pneg %p4067_p7 }
  0x86   : > { %p4074_p4 = por %p4073_p2, %p4072_p1 }
  0x88   : > { %p4075_p10 = pnand %p4074_p4, %p4068_p9 }
  0x8a   : > { %4078 = shalt.err (!%p4075_p10)
}
  0x8b   : > { %s4079_s9 = scalar_lea.vmem %s4435_s7, 1280  ;;  %s4209_s21 = smov [#allocation2]  }
  0x8c   : > { %p4080_p8 = scmp.ne.s32.totalorder %s4435_s7, %s4079_s9  ;;  %s4084_s17 = sshll.u32 %s4209_s21, 4  ;;  %s4085_s17 = int_to_ptr.vmem [resolvable:$false] %s4084_s17 }
  0x8d   : > { %s4086_s1 = scalar_lea.vmem %s4085_s17, 2560  ;;  %p4087_p7 = scmp.lt.s32.totalorder %s4435_s7, %s4085_s17 }
  0x8e   : > { %p4082_p13 = pnand %p4080_p8, %p4066_p5  ;;  %p4088_p12 = scmp.lt.s32.totalorder %s4086_s1, %s4079_s9 }
  0x90   : > { %p4083_p3 = pneg %p4082_p13  ;;  %p4089_p11 = por %p4088_p12, %p4087_p7 }
  0x92   : > { %p4090_p1 = pnand %p4089_p11, %p4083_p3 }
  0x94   : > { %4093 = shalt.err (!%p4090_p1)
}
  0x95   : > { %s5027_s24 = smov 4   ;;  %s5028_s19 = smov 64  }
  0x96   : > { %3779 = dma.hbm_to_vmem [thread:$0]  (!%p4428_p0), %s4440_s22, 1280, %s4435_s7, %s4442_s10, %s5028_s19, %s5028_s19, %s5027_s24  }
  0x97   : > { %p5029_p5 = scmp.ne.s32.totalorder %s5018_s15, 0 }
  0x98   : > { %s4476_s28 = sand.u32 (!%p5029_p5), 1, %s4176_s25   ;;  %p5030_p9 = scmp.ne.s32.totalorder (!%p5029_p5), %s5015_s13, 0 }
  0x99   : > { %310 = sbr.rel (%p5029_p5) target bundleno = 1112 (0x458), region = 48  ;;  %s313_s3 = scalar_lea.sflag (!%p5029_p5), [#allocation3], %s4476_s28 }
  0x9a   : > { %s3749_s23 = smul.u32 (!%p5029_p5), 80, %s4476_s28 }
  0x9c   : > { %s4480_s5 = scalar_lea.vmem (!%p5029_p5), [#allocation2], %s3749_s23 }
  0xa0   : > { %4155 = dma.done.wait (%p5030_p9), %s313_s3, 1280  }
  0xa1   : > { %4157 = vsyncadd (%p5030_p9), %s313_s3, 4294966016  ;;  %p5031_p0 = scmp.ne.s32.totalorder %s5013_s11, 0 }
  0xa3   : > { %4159 = dma.done.wait (%p5031_p0), [#allocation6], 11264  }
  0xa4   : > { %4161 = vsyncadd (%p5031_p0), [#allocation6], 4294956032 }
  0xa5   : > { %4163 = dma.done.wait (%p5031_p0), [#allocation9], 1024  }
  0xa6   : > { %4165 = vsyncadd (%p5031_p0), [#allocation9], 4294966272  ;;  %v4210_v0 = vmov 0   ;;  %v3866_v1 = vld [vmem:[#allocation5 + $0x4] ss:$8 sps:$4 sm:$0xff]   ;;  %v3902_v20 = vld [vmem:[#allocation7 + $0x50] sm:$0xff]  }
  0xa7   : > { %569 = vmatprep.mubr.bf16.mxu0 %v4210_v0  ;;  %v3868_v2 = vld [vmem:[#allocation5] ss:$8 sps:$4 sm:$0xff]   ;;  %537 = vmatprep.subr.bf16.mxu0 %v3866_v1  ;;  %v3869_v3 = vld [vmem:[#allocation5 + $0x14] ss:$8 sps:$4 sm:$0xff]   ;;  %v3871_v4 = vld [vmem:[#allocation5 + $0x10] ss:$8 sps:$4 sm:$0xff]  }
  0xa8   : > { %538 = vmatpush1.bf16.msra.mxu0 %v3868_v2  ;;  %v3872_v5 = vld [vmem:[#allocation5 + $0x24] ss:$8 sps:$4 sm:$0xff]   ;;  %v3874_v6 = vld [vmem:[#allocation5 + $0x20] ss:$8 sps:$4 sm:$0xff]   ;;  %v3875_v7 = vld [vmem:[#allocation5 + $0x34] ss:$8 sps:$4 sm:$0xff]  }
  0xa9   : > { %539 = vmatprep.subr.bf16.mxu0 %v3869_v3  ;;  %v3877_v8 = vld [vmem:[#allocation5 + $0x30] ss:$8 sps:$4 sm:$0xff]   ;;  %v3878_v9 = vld [vmem:[#allocation5 + $0x44] ss:$8 sps:$4 sm:$0xff]   ;;  %v3880_v10 = vld [vmem:[#allocation5 + $0x40] ss:$8 sps:$4 sm:$0xff]  }
  0xaa   : > { %v3881_v11 = vld [vmem:[#allocation5 + $0x54] ss:$8 sps:$4 sm:$0xff]   ;;  %v3883_v12 = vld [vmem:[#allocation5 + $0x50] ss:$8 sps:$4 sm:$0xff]   ;;  %v3884_v13 = vld [vmem:[#allocation5 + $0x64] ss:$8 sps:$4 sm:$0xff]  }
  0xab   : > { %v3886_v14 = vld [vmem:[#allocation5 + $0x60] ss:$8 sps:$4 sm:$0xff]   ;;  %v3887_v15 = vld [vmem:[#allocation5 + $0x74] ss:$8 sps:$4 sm:$0xff]   ;;  %v3889_v16 = vld [vmem:[#allocation5 + $0x70] ss:$8 sps:$4 sm:$0xff]  }
  0xac   : > { %540 = vmatpush1.bf16.msra.mxu0 %v3871_v4  ;;  %v3900_v17 = vld [vmem:[#allocation7 + $0x40] sm:$0xff]   ;;  %v3901_v19 = vld [vmem:[#allocation7 + $0x48] sm:$0xff]   ;;  %v3903_v22 = vld [vmem:[#allocation7 + $0x58] sm:$0xff]   ;;  %p723_p2 = scmp.eq.s32.totalorder %s4184_s27, 0  ;;  %vm821_vm2 = vcmask 1040384   ;;  %p727_p4 = scmp.eq.s32.totalorder %s4184_s27, 1 }
  0xad   : > { %541 = vmatprep.subr.bf16.mxu0 %v3872_v5  ;;  %v3890_v18 = vld [vmem:[%s4480_s5] sm:$0xff]   ;;  %v3891_v21 = vld [vmem:[%s4480_s5 + $0x8] sm:$0xff]   ;;  %v3892_v23 = vld [vmem:[%s4480_s5 + $0x10] sm:$0xff]   ;;  %vm822_vm3 = vsmask.f32 256  ;;  %vm864_vm6 = vcmask 1047552  }
  0xae   : > { %v3893_v24 = vld [vmem:[%s4480_s5 + $0x18] sm:$0xff]   ;;  %v3894_v25 = vld [vmem:[%s4480_s5 + $0x20] sm:$0xff]   ;;  %v3895_v26 = vld [vmem:[%s4480_s5 + $0x28] sm:$0xff]   ;;  %s724_s11 = scalar_select %p723_p2, 1, 0 }
  0xaf   : > { %v3896_v27 = vld [vmem:[%s4480_s5 + $0x30] sm:$0xff]   ;;  %v3897_v28 = vld [vmem:[%s4480_s5 + $0x38] sm:$0xff]   ;;  %v3898_v29 = vld [vmem:[%s4480_s5 + $0x40] sm:$0xff]   ;;  %s728_s7 = scalar_select %p727_p4, 1, 0 }
  0xb0   : > { %542 = vmatpush1.bf16.msra.mxu0 %v3874_v6  ;;  %v3899_v30 = vld [vmem:[%s4480_s5 + $0x48] sm:$0xff]   ;;  %v3904_v31 = vld [vmem:[#allocation7 + $0xc0] sm:$0xff]   ;;  %v3908_v35 = vld [vmem:[#allocation7 + $0xd0] sm:$0xff]   ;;  %v725_v47 = vstv %s724_s11  ;;  %vm865_vm7 = vsmask.f32 7424  ;;  %s5040_s9 = sld [smem:[#allocation21_spill]] }
  0xb1   : > { %543 = vmatprep.subr.bf16.mxu0 %v3875_v7  ;;  %v3905_v32 = vld [vmem:[#allocation7 + $0x60] sm:$0xff]   ;;  %3378 = vmatprep.subr.bf16.mxu1 %v3904_v31  ;;  %v3906_v33 = vld [vmem:[#allocation7 + $0xc8] sm:$0xff]   ;;  %v3909_v36 = vld [vmem:[#allocation7 + $0x70] sm:$0xff]   ;;  %vm4525_vm0 = vcmp.eq.s32.totalorder %v725_v47, 1  ;;  %s2921_s21 = sshll.u32 %s4476_s28, 6  ;;  %s5041_s1 = sld [smem:[#allocation16_spill]] }
  0xb2   : > { %3379 = vmatpush3.bf16.msra.mxu1 %v3904_v31  ;;  %v3907_v34 = vld [vmem:[#allocation7 + $0x68] sm:$0xff]   ;;  %v3910_v37 = vld [vmem:[#allocation7 + $0xd8] sm:$0xff]   ;;  %v3912_v39 = vld [vmem:[#allocation7 + $0xe0] sm:$0xff]   ;;  %s4895_s17 = scalar_lea.vmem [#allocation10], %s2921_s21  ;;  %s3074_s24 = sshll.u32 %s4184_s27, 4 }
  0xb3   : > { %3380 = vmatprep.subr.bf16.mxu1 %v3906_v33  ;;  %v3911_v38 = vld [vmem:[#allocation7 + $0x78] sm:$0xff]   ;;  %v3913_v40 = vld [vmem:[#allocation7 + $0xe8] sm:$0xff]   ;;  %v3914_v41 = vld [vmem:[#allocation7 + $0xf0] sm:$0xff]   ;;  %s2790_s3 = sshll.u32 %s4895_s17, 4  ;;  %s5042_s13 = sld [smem:[#allocation22_spill]]  ;;  %s4933_s3 = int_to_ptr.vmem [resolvable:$true] %s2790_s3 }
  0xb4   : > { %544 = vmatpush1.bf16.msra.mxu0 %v3877_v8  ;;  %v3915_v42 = vld [vmem:[#allocation7 + $0xf8] sm:$0xff]   ;;  %v3916_v43 = vld [vmem:[#allocation7] sm:$0xff]   ;;  %vm2957_vm1 = vmneg %vm4525_vm0  ;;  %s4094_s20 = scalar_lea.vmem %s4933_s3, 1024  ;;  %s4211_s22 = smov [#allocation10]  }
  0xb5   : > { %545 = vmatprep.subr.bf16.mxu0 %v3878_v9  ;;  %v4514_v44 = vld [vmem:[#allocation7 + $0x100] sm:$0xff]   ;;  %v3917_v2 = vld [vmem:[#allocation7 + $0x8] sm:$0xff]   ;;  %vm4553_vm4 = vmand %vm821_vm2, %vm822_vm3  ;;  %p4095_p10 = scmp.ne.s32.totalorder %s4933_s3, %s4094_s20  ;;  %s4098_s10 = sshll.u32 %s4211_s22, 4  ;;  %s4099_s10 = int_to_ptr.vmem [resolvable:$false] %s4098_s10 }
  0xb6   : > { %3381 = vmatpush3.bf16.msra.mxu1 %v3906_v33  ;;  %v4521_v45 = vld [vmem:[%s4991_s2] ss:$0 sm:$0xff]  ;;  %vm4744_vm8 = vmand %vm864_vm6, %vm865_vm7  ;;  %s4100_s6 = scalar_lea.vmem %s4099_s10, 2048  ;;  %p4101_p3 = scmp.lt.s32.totalorder %s4933_s3, %s4099_s10 }
  0xb7   : > { %3382 = vmatprep.subr.bf16.mxu1 %v3908_v35  ;;  %v3921_v31 = vld [vmem:[#allocation7 + $0x20] sm:$0xff]   ;;  %s3054_s19 = sshll.u32 %s5041_s1, 5  ;;  %p4096_p8 = pnand %p4095_p10, %p4416_p6 }
  0xb8   : > { %546 = vmatpush1.bf16.msra.mxu0 %v3880_v10  ;;  %s2787_s23 = sadd.s32 %s3074_s24, %s3054_s19  ;;  %p4102_p7 = scmp.lt.s32.totalorder %s4100_s6, %s4094_s20 }
  0xb9   : > { %547 = vmatprep.subr.bf16.mxu0 %v3881_v11  ;;  %s3055_s27 = sshll.u32 %s2787_s23, 6  ;;  %p4097_p13 = pneg %p4096_p8 }
  0xba   : > { %3383 = vmatpush3.bf16.msra.mxu1 %v3908_v35  ;;  %s4931_s15 = scalar_lea.hbm %s5042_s13, %s3055_s27  ;;  %p4103_p12 = por %p4102_p7, %p4101_p3 }
  0xbb   : > { %3384 = vmatprep.subr.bf16.mxu1 %v3910_v37 }
  0xbc   : > { %548 = vmatpush1.bf16.msra.mxu0 %v3883_v12  ;;  %p4104_p11 = pnand %p4103_p12, %p4097_p13 }
  0xbd   : > { %549 = vmatprep.subr.bf16.mxu0 %v3884_v13  ;;  %v3918_v13 = vld [vmem:[#allocation7 + $0x10] sm:$0xff]  }
  0xbe   : > { %3385 = vmatpush3.bf16.msra.mxu1 %v3910_v37  ;;  %v3922_v37 = vld [vmem:[#allocation7 + $0x108] sm:$0xff]  }
  0xbf   : > { %3386 = vmatprep.subr.bf16.mxu1 %v3912_v39 }
  0xc0   : > { %550 = vmatpush1.bf16.msra.mxu0 %v3886_v14 }
  0xc1   : > { %551 = vmatprep.subr.bf16.mxu0 %v3887_v15 }
  0xc2   : > { %3387 = vmatpush3.bf16.msra.mxu1 %v3912_v39 }
  0xc3   : > { %3388 = vmatprep.subr.bf16.mxu1 %v3913_v40 }
  0xc4   : > { %552 = vmatpush1.bf16.msra.mxu0 %v3889_v16 }
  0xc5   : > { %3282 = vmatprep.subr.bf16.mxu0 %v3900_v17 }
  0xc6   : > { %3389 = vmatpush3.bf16.msra.mxu1 %v3913_v40  ;;  %v3923_v40 = vld [vmem:[#allocation7 + $0x28] sm:$0xff]  }
  0xc7   : > { %570 = vmatmul.mubr.bf16.vlgmr.msra.gmra.mrb[0].mxu0 %v3890_v18  ;;  %3390 = vmatprep.subr.bf16.mxu1 %v3914_v41  ;;  %v3967_v18 = vld [vmem:[#allocation7 + $0x218] sm:$0xff]  }
  0xc8   : > { %577 = vmatprep.mubr.bf16.mxu0 %v4210_v0  ;;  %3283 = vmatpush3.bf16.msra.mxu0 %v3900_v17 }
  0xc9   : > { %3284 = vmatprep.subr.bf16.mxu0 %v3901_v19 }
  0xca   : > { %3391 = vmatpush3.bf16.msra.mxu1 %v3914_v41 }
  0xcb   : > { %3392 = vmatprep.subr.bf16.mxu1 %v3915_v42 }
  0xcc   : > { %3285 = vmatpush3.bf16.msra.mxu0 %v3901_v19 }
  0xcd   : > { %3286 = vmatprep.subr.bf16.mxu0 %v3902_v20 }
  0xce   : > { %3393 = vmatpush3.bf16.msra.mxu1 %v3915_v42 }
  0xcf   : > { %578 = vmatmul.mubr.bf16.gmra.mrb[4].mxu0 %v3891_v21  ;;  %3410 = vmatprep.subr.bf16.mxu1 %v4514_v44  ;;  %v3919_v21 = vld [vmem:[#allocation7 + $0x18] sm:$0xff]  }
  0xd0   : > { %587 = vmatprep.mubr.bf16.mxu0 %v4210_v0  ;;  %3287 = vmatpush3.bf16.msra.mxu0 %v3902_v20 }
  0xd1   : > { %3288 = vmatprep.subr.bf16.mxu0 %v3903_v22 }
  0xd4   : > { %3289 = vmatpush3.bf16.msra.mxu0 %v3903_v22 }
  0xd5   : > { %3290 = vmatprep.subr.bf16.mxu0 %v3905_v32 }
  0xd7   : > { %588 = vmatmul.mubr.bf16.gmra.mrb[8].mxu0 %v3892_v23 }
  0xd8   : > { %597 = vmatprep.mubr.bf16.mxu0 %v4210_v0  ;;  %3291 = vmatpush3.bf16.msra.mxu0 %v3905_v32 }
  0xd9   : > { %3292 = vmatprep.subr.bf16.mxu0 %v3907_v34 }
  0xdc   : > { %3293 = vmatpush3.bf16.msra.mxu0 %v3907_v34 }
  0xdd   : > { %3294 = vmatprep.subr.bf16.mxu0 %v3909_v36 }
  0xdf   : > { %598 = vmatmul.mubr.bf16.gmra.mrb[12].mxu0 %v3893_v24 }
  0xe0   : > { %607 = vmatprep.mubr.bf16.mxu0 %v4210_v0  ;;  %3295 = vmatpush3.bf16.msra.mxu0 %v3909_v36 }
  0xe1   : > { %3296 = vmatprep.subr.bf16.mxu0 %v3911_v38 }
  0xe4   : > { %3297 = vmatpush3.bf16.msra.mxu0 %v3911_v38 }
  0xe5   : > { %3314 = vmatprep.subr.bf16.mxu0 %v3916_v43 }
  0xe7   : > { %608 = vmatmul.mubr.bf16.gmra.mrb[16].mxu0 %v3894_v25 }
  0xe8   : > { %617 = vmatprep.mubr.bf16.mxu0 %v4210_v0 }
  0xef   : > { %618 = vmatmul.mubr.bf16.gmra.mrb[20].mxu0 %v3895_v26 }
  0xf0   : > { %627 = vmatprep.mubr.bf16.mxu0 %v4210_v0 }
  0xf7   : > { %628 = vmatmul.mubr.bf16.gmra.mrb[24].mxu0 %v3896_v27 }
  0xf8   : > { %637 = vmatprep.mubr.bf16.mxu0 %v4210_v0 }
  0xff   : > { %638 = vmatmul.mubr.bf16.gmra.mrb[28].mxu0 %v3897_v28 }
 0x100   : > { %647 = vmatprep.mubr.bf16.mxu0 %v4210_v0 }
 0x107   : > { %648 = vmatmul.mubr.bf16.gmra.mrb[32].mxu0 %v3898_v29 }
 0x108   : > { %657 = vmatprep.mubr.bf16.mxu0 %v4210_v0 }
 0x10f   : > { %658 = vmatmul.mubr.bf16.gmra.mrb[36].mxu0 %v3899_v30 }
 0x19a   : > { %v571_v46 = vpop.f32.mrb[0].mxu0 }
 0x19b   : > { %v673_v48 = vadd.f32 %v4521_v45, %v571_v46  ;;  %v573_v49 = vpop.f32.mrb[1].mxu0 }
 0x19c   : > { %v574_v50 = vpop.f32.mrb[2].mxu0  ;;  %v3924_v49 = vld [vmem:[#allocation7 + $0x110] sm:$0xff]  }
 0x19d   : > { %v674_v51 = vadd.f32 %v4521_v45, %v574_v50  ;;  %v576_v52 = vpop.f32.mrb[3].mxu0  ;;  %v693_v54 = vmax.f32 %v673_v48, 0.0 }
 0x19f   : > { %v694_v55 = vmax.f32 %v674_v51, 0.0 }
 0x1a1   : > { %v4531_v56 = vpack.c.bf16 %v694_v55, %v693_v54  ;;  %v3925_v54 = vld [vmem:[#allocation7 + $0x30] sm:$0xff]  }
 0x1a2   : > { %v579_v57 = vpop.f32.mrb[4].mxu0 }
 0x1a3   : > { %v675_v58 = vadd.f32 %v4521_v45, %v579_v57  ;;  %v4534_v59 = vpop.f32.mrb[5].mxu0  ;;  %3298 = vmatprep.mubr.msk.bf16.mxu0 %vm2957_vm1, %v4531_v56 }
 0x1a4   : > { %v583_v60 = vpop.f32.mrb[6].mxu0 }
 0x1a5   : > { %v676_v61 = vadd.f32 %v4521_v45, %v583_v60  ;;  %v4538_v62 = vpop.f32.mrb[7].mxu0  ;;  %v695_v63 = vmax.f32 %v675_v58, 0.0 }
 0x1a7   : > { %v696_v0 = vmax.f32 %v676_v61, 0.0 }
 0x1a9   : > { %v4540_v1 = vpack.c.bf16 %v696_v0, %v695_v63 }
 0x1aa   : > { %v589_v3 = vpop.f32.mrb[8].mxu0 }
 0x1ab   : > { %v677_v4 = vadd.f32 %v4521_v45, %v589_v3  ;;  %v4543_v5 = vpop.f32.mrb[9].mxu0  ;;  %3299 = vmatmul.mubr.bf16.vlgmr.msra.gmra.mrb[40].mxu0 %v4540_v1  ;;  %v749_v6 = vshrl.u32 %v4540_v1, 16  ;;  %v752_v7 = vshll.u32 %v4540_v1, 16 }
 0x1ac   : > { %v593_v8 = vpop.f32.mrb[10].mxu0  ;;  %3315 = vmatpush3.bf16.msra.mxu0 %v3916_v43 }
 0x1ad   : > { %v678_v9 = vadd.f32 %v4521_v45, %v593_v8  ;;  %v4549_v10 = vpop.f32.mrb[11].mxu0  ;;  %v751_v11 = vrot.slane %v749_v6, 7  ;;  %v836_v12 = vrot.slane %v752_v7, 1  ;;  %3316 = vmatprep.subr.bf16.mxu0 %v3917_v2  ;;  %v697_v14 = vmax.f32 %v677_v4, 0.0 }
 0x1af   : > { %v698_v15 = vmax.f32 %v678_v9, 0.0  ;;  %v754_v16 = vor.u32 %v752_v7, %v751_v11  ;;  %v4551_v17 = vor.u32 %v836_v12, %v749_v6  ;;  %v3928_v11 = vld [vmem:[#allocation7 + $0x120] sm:$0xff]  }
 0x1b0   : > { %3317 = vmatpush3.bf16.msra.mxu0 %v3917_v2  ;;  %v3927_v2 = vld [vmem:[#allocation7 + $0x38] sm:$0xff]  }
 0x1b1   : > { %v4557_v19 = vpack.c.bf16 %v698_v15, %v697_v14  ;;  %v4561_v20 = vsel %vm4553_vm4, 0, %v754_v16  ;;  %3318 = vmatprep.subr.bf16.mxu0 %v3918_v13  ;;  %v4610_v15 = vld [vmem:[#allocation7 + $0x80] sm:$0xff]  }
 0x1b2   : > { %v599_v22 = vpop.f32.mrb[12].mxu0  ;;  %3394 = vmatprep.mubr.bf16.mxu1 %v4561_v20 }
 0x1b3   : > { %v679_v23 = vadd.f32 %v4521_v45, %v599_v22  ;;  %v4565_v24 = vpop.f32.mrb[13].mxu0  ;;  %3302 = vmatprep.mubr.bf16.mxu0 %v4557_v19  ;;  %v756_v25 = vshrl.u32 %v4557_v19, 16  ;;  %v759_v26 = vshll.u32 %v4557_v19, 16 }
 0x1b4   : > { %v603_v27 = vpop.f32.mrb[14].mxu0  ;;  %3319 = vmatpush3.bf16.msra.mxu0 %v3918_v13 }
 0x1b5   : > { %v680_v28 = vadd.f32 %v4521_v45, %v603_v27  ;;  %v4571_v29 = vpop.f32.mrb[15].mxu0  ;;  %v758_v30 = vrot.slane %v756_v25, 7  ;;  %3320 = vmatprep.subr.bf16.mxu0 %v3919_v21  ;;  %v838_v32 = vrot.slane %v759_v26, 1  ;;  %v699_v33 = vmax.f32 %v679_v23, 0.0 }
 0x1b7   : > { %v700_v34 = vmax.f32 %v680_v28, 0.0  ;;  %v761_v35 = vor.u32 %v759_v26, %v758_v30  ;;  %v4573_v36 = vor.u32 %v838_v32, %v756_v25  ;;  %v3930_v26 = vld [vmem:[#allocation7 + $0x128] sm:$0xff]  }
 0x1b8   : > { %3321 = vmatpush3.bf16.msra.mxu0 %v3919_v21 }
 0x1b9   : > { %v4575_v38 = vpack.c.bf16 %v700_v34, %v699_v33  ;;  %v4579_v39 = vsel %vm4553_vm4, 0, %v761_v35  ;;  %3322 = vmatprep.subr.bf16.mxu0 %v3921_v31 }
 0x1ba   : > { %v609_v41 = vpop.f32.mrb[16].mxu0  ;;  %3395 = vmatmul.mubr.bf16.vlgmr.msra.gmra.mrb[0].mxu1 %v4579_v39 }
 0x1bb   : > { %v681_v42 = vadd.f32 %v4521_v45, %v609_v41  ;;  %v4583_v43 = vpop.f32.mrb[17].mxu0  ;;  %3303 = vmatmul.mubr.bf16.gmra.mrb[44].mxu0 %v4575_v38  ;;  %v763_v46 = vshrl.u32 %v4575_v38, 16  ;;  %v766_v47 = vshll.u32 %v4575_v38, 16  ;;  %3411 = vmatpush3.bf16.msra.mxu1 %v4514_v44  ;;  %v3926_v44 = vld [vmem:[#allocation7 + $0x118] sm:$0xff]  }
 0x1bc   : > { %v613_v48 = vpop.f32.mrb[18].mxu0  ;;  %3323 = vmatpush3.bf16.msra.mxu0 %v3921_v31  ;;  %3412 = vmatprep.subr.bf16.mxu1 %v3922_v37  ;;  %v4625_v31 = vsel %vm4525_vm0, 0, %v4531_v56 }
 0x1bd   : > { %v682_v50 = vadd.f32 %v4521_v45, %v613_v48  ;;  %v4590_v51 = vpop.f32.mrb[19].mxu0  ;;  %v765_v52 = vrot.slane %v763_v46, 7  ;;  %3324 = vmatprep.subr.bf16.mxu0 %v3923_v40  ;;  %v840_v55 = vrot.slane %v766_v47, 1  ;;  %v701_v57 = vmax.f32 %v681_v42, 0.0 }
 0x1bf   : > { %v702_v58 = vmax.f32 %v682_v50, 0.0  ;;  %v768_v60 = vor.u32 %v766_v47, %v765_v52  ;;  %3413 = vmatpush3.bf16.msra.mxu1 %v3922_v37  ;;  %v4592_v61 = vor.u32 %v840_v55, %v763_v46  ;;  %v742_v46 = vshrl.u32 %v4625_v31, 16  ;;  %v3934_v52 = vld [vmem:[#allocation7 + $0x138] sm:$0xff]  }
 0x1c0   : > { %3325 = vmatpush3.bf16.msra.mxu0 %v3923_v40  ;;  %3414 = vmatprep.subr.bf16.mxu1 %v3924_v49  ;;  %v3932_v40 = vld [vmem:[#allocation7 + $0x130] sm:$0xff]  }
 0x1c1   : > { %v4594_v63 = vpack.c.bf16 %v702_v58, %v701_v57  ;;  %v4598_v0 = vsel %vm4553_vm4, 0, %v768_v60  ;;  %3326 = vmatprep.subr.bf16.mxu0 %v3925_v54 }
 0x1c2   : > { %v619_v3 = vpop.f32.mrb[20].mxu0  ;;  %3398 = vmatprep.mubr.bf16.mxu1 %v4598_v0 }
 0x1c3   : > { %v683_v4 = vadd.f32 %v4521_v45, %v619_v3  ;;  %v4602_v6 = vpop.f32.mrb[21].mxu0  ;;  %3306 = vmatprep.mubr.bf16.mxu0 %v4594_v63  ;;  %v770_v7 = vshrl.u32 %v4594_v63, 16  ;;  %v773_v8 = vshll.u32 %v4594_v63, 16  ;;  %3415 = vmatpush3.bf16.msra.mxu1 %v3924_v49 }
 0x1c4   : > { %v623_v9 = vpop.f32.mrb[22].mxu0  ;;  %3327 = vmatpush3.bf16.msra.mxu0 %v3925_v54  ;;  %3416 = vmatprep.subr.bf16.mxu1 %v3926_v44 }
 0x1c5   : > { %v684_v12 = vadd.f32 %v4521_v45, %v623_v9  ;;  %v4608_v13 = vpop.f32.mrb[23].mxu0  ;;  %v772_v14 = vrot.slane %v770_v7, 7  ;;  %3328 = vmatprep.subr.bf16.mxu0 %v3927_v2  ;;  %v842_v16 = vrot.slane %v773_v8, 1  ;;  %v703_v21 = vmax.f32 %v683_v4, 0.0  ;;  %v4653_v4 = vld [vmem:[#allocation7 + $0x140] sm:$0xff]  }
 0x1c7   : > { %v704_v22 = vmax.f32 %v684_v12, 0.0  ;;  %v775_v23 = vor.u32 %v773_v8, %v772_v14  ;;  %3417 = vmatpush3.bf16.msra.mxu1 %v3926_v44  ;;  %v4612_v25 = vor.u32 %v842_v16, %v770_v7  ;;  %v745_v12 = vshll.u32 %v4625_v31, 16  ;;  %v3944_v31 = vld [vmem:[#allocation7 + $0x160] sm:$0xff]  }
 0x1c8   : > { %3329 = vmatpush3.bf16.msra.mxu0 %v3927_v2  ;;  %3418 = vmatprep.subr.bf16.mxu1 %v3928_v11  ;;  %v744_v2 = vrot.slane %v742_v46, 7 }
 0x1c9   : > { %v4614_v27 = vpack.c.bf16 %v704_v22, %v703_v21  ;;  %v4618_v28 = vsel %vm4553_vm4, 0, %v775_v23  ;;  %3346 = vmatprep.subr.bf16.mxu0 %v4610_v15 }
 0x1ca   : > { %v629_v30 = vpop.f32.mrb[24].mxu0  ;;  %3399 = vmatmul.mubr.bf16.gmra.mrb[4].mxu1 %v4618_v28  ;;  %v747_v22 = vor.u32 %v745_v12, %v744_v2  ;;  %v3931_v2 = vld [vmem:[#allocation7 + $0x88] sm:$0xff]  }
 0x1cb   : > { %v685_v32 = vadd.f32 %v4521_v45, %v629_v30  ;;  %v4628_v33 = vpop.f32.mrb[25].mxu0  ;;  %3307 = vmatmul.mubr.bf16.gmra.mrb[48].mxu0 %v4614_v27  ;;  %v777_v34 = vshrl.u32 %v4614_v27, 16  ;;  %v780_v35 = vshll.u32 %v4614_v27, 16  ;;  %3419 = vmatpush3.bf16.msra.mxu1 %v3928_v11 }
 0x1cc   : > { %v633_v37 = vpop.f32.mrb[26].mxu0  ;;  %3420 = vmatprep.subr.bf16.mxu1 %v3930_v26 }
 0x1cd   : > { %v686_v41 = vadd.f32 %v4521_v45, %v633_v37  ;;  %v4634_v42 = vpop.f32.mrb[27].mxu0  ;;  %v779_v53 = vrot.slane %v777_v34, 7  ;;  %v844_v56 = vrot.slane %v780_v35, 1  ;;  %v705_v47 = vmax.f32 %v685_v32, 0.0 }
 0x1cf   : > { %v706_v48 = vmax.f32 %v686_v41, 0.0  ;;  %v782_v49 = vor.u32 %v780_v35, %v779_v53  ;;  %3421 = vmatpush3.bf16.msra.mxu1 %v3930_v26  ;;  %v4637_v50 = vor.u32 %v844_v56, %v777_v34  ;;  %v824_v35 = vsel %vm4553_vm4, 0, %v747_v22 }
 0x1d0   : > { %3422 = vmatprep.subr.bf16.mxu1 %v3932_v40 }
 0x1d1   : > { %v4639_v54 = vpack.c.bf16 %v706_v48, %v705_v47  ;;  %v4643_v55 = vsel %vm4553_vm4, 0, %v782_v49 }
 0x1d2   : > { %v639_v57 = vpop.f32.mrb[28].mxu0  ;;  %3402 = vmatprep.mubr.bf16.mxu1 %v4643_v55 }
 0x1d3   : > { %v687_v58 = vadd.f32 %v4521_v45, %v639_v57  ;;  %v4647_v60 = vpop.f32.mrb[29].mxu0  ;;  %3310 = vmatprep.mubr.bf16.mxu0 %v4639_v54  ;;  %v784_v44 = vshrl.u32 %v4639_v54, 16  ;;  %3423 = vmatpush3.bf16.msra.mxu1 %v3932_v40  ;;  %v787_v11 = vshll.u32 %v4639_v54, 16 }
 0x1d4   : > { %v643_v3 = vpop.f32.mrb[30].mxu0  ;;  %3424 = vmatprep.subr.bf16.mxu1 %v3934_v52 }
 0x1d5   : > { %v688_v7 = vadd.f32 %v4521_v45, %v643_v3  ;;  %v4656_v8 = vpop.f32.mrb[31].mxu0  ;;  %v786_v9 = vrot.slane %v784_v44, 7  ;;  %v707_v14 = vmax.f32 %v687_v58, 0.0 }
 0x1d7   : > { %v708_v16 = vmax.f32 %v688_v7, 0.0  ;;  %v789_v21 = vor.u32 %v787_v11, %v786_v9  ;;  %3425 = vmatpush3.bf16.msra.mxu1 %v3934_v52 }
 0x1d8   : > { %3442 = vmatprep.subr.bf16.mxu1 %v4653_v4 }
 0x1d9   : > { %v4667_v23 = vpack.c.bf16 %v708_v16, %v707_v14  ;;  %v4671_v26 = vsel %vm4553_vm4, 0, %v789_v21  ;;  %v729_v21 = vstv %s728_s7  ;;  %s2774_s7 = scalar_lea.sflag [#allocation4], %s4476_s28 }
 0x1da   : > { %v649_v30 = vpop.f32.mrb[32].mxu0  ;;  %3403 = vmatmul.mubr.bf16.gmra.mrb[8].mxu1 %v4671_v26  ;;  %vm4708_vm5 = vcmp.eq.s32.totalorder %v729_v21, 1  ;;  %v3939_v21 = vld [vmem:[#allocation7 + $0xa8] sm:$0xff]  }
 0x1db   : > { %v689_v32 = vadd.f32 %v4521_v45, %v649_v30  ;;  %v4675_v34 = vpop.f32.mrb[33].mxu0  ;;  %3311 = vmatmul.mubr.bf16.gmra.mrb[52].mxu0 %v4667_v23  ;;  %v791_v37 = vshrl.u32 %v4667_v23, 16  ;;  %v794_v47 = vshll.u32 %v4667_v23, 16  ;;  %vm3015_vm9 = vmneg %vm4708_vm5 }
 0x1dc   : > { %v653_v40 = vpop.f32.mrb[34].mxu0  ;;  %3330 = vmatprep.mubr.bf16.mxu0 %v824_v35 }
 0x1dd   : > { %v690_v41 = vadd.f32 %v4521_v45, %v653_v40  ;;  %v4683_v53 = vpop.f32.mrb[35].mxu0  ;;  %v793_v56 = vrot.slane %v791_v37, 7  ;;  %v709_v48 = vmax.f32 %v689_v32, 0.0  ;;  %v3933_v32 = vld [vmem:[#allocation7 + $0x90] sm:$0xff]  }
 0x1df   : > { %v710_v49 = vmax.f32 %v690_v41, 0.0  ;;  %v796_v52 = vor.u32 %v794_v47, %v793_v56 }
 0x1e1   : > { %v4690_v57 = vpack.c.bf16 %v710_v49, %v709_v48  ;;  %v4694_v58 = vsel %vm4553_vm4, 0, %v796_v52  ;;  %v3935_v49 = vld [vmem:[#allocation7 + $0x98] sm:$0xff]  }
 0x1e2   : > { %3406 = vmatprep.mubr.bf16.mxu1 %v4694_v58  ;;  %v659_v3 = vpop.f32.mrb[36].mxu0 }
 0x1e3   : > { %3331 = vmatmul.mubr.bf16.vlgmr.msra.gmra.mrb[40].mxu0 %v4561_v20  ;;  %v798_v7 = vshrl.u32 %v4690_v57, 16  ;;  %v691_v9 = vadd.f32 %v4521_v45, %v659_v3  ;;  %v661_v14 = vpop.f32.mrb[37].mxu0  ;;  %v801_v30 = vshll.u32 %v4690_v57, 16  ;;  %v3937_v3 = vld [vmem:[#allocation7 + $0xa0] sm:$0xff]  }
 0x1e4   : > { %3334 = vmatprep.mubr.bf16.mxu0 %v4579_v39  ;;  %3347 = vmatpush3.bf16.msra.mxu0 %v4610_v15  ;;  %v662_v16 = vpop.f32.mrb[38].mxu0  ;;  %v3976_v15 = vld [vmem:[#allocation8 + $0x20] sm:$0xff]  }
 0x1e5   : > { %3348 = vmatprep.subr.bf16.mxu0 %v3931_v2  ;;  %v800_v22 = vrot.slane %v798_v7, 7  ;;  %v711_v35 = vmax.f32 %v691_v9, 0.0  ;;  %v692_v20 = vadd.f32 %v4521_v45, %v662_v16  ;;  %v664_v40 = vpop.f32.mrb[39].mxu0  ;;  %v3938_v16 = vld [vmem:[#allocation7 + $0x148] sm:$0xff]  }
 0x1e6   : > { %v3943_v40 = vld [vmem:[#allocation7 + $0xb8] sm:$0xff]  }
 0x1e7   : > { %v803_v41 = vor.u32 %v801_v30, %v800_v22  ;;  %v712_v56 = vmax.f32 %v692_v20, 0.0  ;;  %v834_v22 = vrot.slane %v745_v12, 1  ;;  %v3942_v12 = vld [vmem:[#allocation7 + $0x158] sm:$0xff]  }
 0x1e8   : > { %3349 = vmatpush3.bf16.msra.mxu0 %v3931_v2 }
 0x1e9   : > { %v4714_v48 = vsel %vm4553_vm4, 0, %v803_v41  ;;  %3350 = vmatprep.subr.bf16.mxu0 %v3933_v32  ;;  %v4716_v52 = vpack.c.bf16 %v712_v56, %v711_v35  ;;  %v3941_v35 = vld [vmem:[#allocation7 + $0xb0] sm:$0xff]   ;;  %v868_v56 = vsel %vm4744_vm8, %v4551_v17, 0  ;;  %v4768_v17 = vsel %vm4744_vm8, %v4592_v61, 0 }
 0x1ea   : > { %3407 = vmatmul.mubr.bf16.gmra.mrb[12].mxu1 %v4714_v48 }
 0x1eb   : > { %3335 = vmatmul.mubr.bf16.gmra.mrb[44].mxu0 %v4598_v0  ;;  %3426 = vmatprep.mubr.bf16.mxu1 %v4540_v1  ;;  %v4724_v45 = vsel %vm4708_vm5, 0, %v4716_v52 }
 0x1ec   : > { %3338 = vmatprep.mubr.bf16.mxu0 %v4618_v28  ;;  %3351 = vmatpush3.bf16.msra.mxu0 %v3933_v32  ;;  %v808_v2 = vshll.u32 %v4724_v45, 16  ;;  %v805_v9 = vshrl.u32 %v4724_v45, 16  ;;  %v3940_v32 = vld [vmem:[#allocation7 + $0x150] sm:$0xff]  }
 0x1ed   : > { %3352 = vmatprep.subr.bf16.mxu0 %v3935_v49  ;;  %v3966_v45 = vld [vmem:[#allocation7 + $0x210] sm:$0xff]  }
 0x1ee   : > { %v852_v14 = vrot.slane %v808_v2, 1 }
 0x1f0   : > { %3353 = vmatpush3.bf16.msra.mxu0 %v3935_v49  ;;  %v4733_v1 = vor.u32 %v852_v14, %v805_v9  ;;  %v4761_v49 = vsel %vm4744_vm8, %v4573_v36, 0  ;;  %v3947_v14 = vld [vmem:[#allocation7 + $0x178] sm:$0xff]   ;;  %v4774_v36 = vsel %vm4744_vm8, %v4612_v25, 0  ;;  %v4785_v25 = vsel %vm4744_vm8, %v4637_v50, 0 }
 0x1f1   : > { %3354 = vmatprep.subr.bf16.mxu0 %v3937_v3 }
 0x1f2   : > { %3427 = vmatmul.mubr.bf16.vlgmr.msra.gmra.mrb[0].mxu1 %v4557_v19 }
 0x1f3   : > { %3443 = vmatpush3.bf16.msra.mxu1 %v4653_v4  ;;  %3339 = vmatmul.mubr.bf16.gmra.mrb[48].mxu0 %v4643_v55  ;;  %v835_v4 = vor.u32 %v834_v22, %v742_v46  ;;  %v3945_v46 = vld [vmem:[#allocation7 + $0x168] sm:$0xff]  }
 0x1f4   : > { %3430 = vmatprep.mubr.bf16.mxu1 %v4575_v38  ;;  %3342 = vmatprep.mubr.bf16.mxu0 %v4671_v26  ;;  %v3949_v22 = vld [vmem:[#allocation7 + $0x188] sm:$0xff]  }
 0x1f5   : > { %3355 = vmatpush3.bf16.msra.mxu0 %v3937_v3  ;;  %3444 = vmatprep.subr.bf16.mxu1 %v3938_v16  ;;  %v867_v41 = vsel %vm4744_vm8, %v835_v4, 0  ;;  %v3946_v3 = vld [vmem:[#allocation7 + $0x170] sm:$0xff]   ;;  %v3952_v4 = vld [vmem:[#allocation7 + $0x1a0] sm:$0xff]  }
 0x1f6   : > { %3356 = vmatprep.subr.bf16.mxu0 %v3939_v21 }
 0x1f7   : > { %3445 = vmatpush3.bf16.msra.mxu1 %v3938_v16  ;;  %v3948_v16 = vld [vmem:[#allocation7 + $0x180] sm:$0xff]  }
 0x1f8   : > { %3446 = vmatprep.subr.bf16.mxu1 %v3940_v32 }
 0x1f9   : > { %3357 = vmatpush3.bf16.msra.mxu0 %v3939_v21  ;;  %v846_v21 = vrot.slane %v787_v11, 1  ;;  %v848_v11 = vrot.slane %v794_v47, 1 }
 0x1fa   : > { %3431 = vmatmul.mubr.bf16.gmra.mrb[4].mxu1 %v4594_v63  ;;  %3358 = vmatprep.subr.bf16.mxu0 %v3941_v35 }
 0x1fb   : > { %3447 = vmatpush3.bf16.msra.mxu1 %v3940_v32  ;;  %3343 = vmatmul.mubr.bf16.gmra.mrb[52].mxu0 %v4694_v58  ;;  %v847_v61 = vor.u32 %v846_v21, %v784_v44  ;;  %v3950_v44 = vld [vmem:[#allocation7 + $0x190] sm:$0xff]   ;;  %v849_v50 = vor.u32 %v848_v11, %v791_v37  ;;  %v850_v37 = vrot.slane %v801_v30, 1  ;;  %v3956_v30 = vld [vmem:[#allocation7 + $0x1c0] sm:$0xff]  }
 0x1fc   : > { %3434 = vmatprep.mubr.bf16.mxu1 %v4614_v27  ;;  %3362 = vmatprep.mubr.bf16.mxu0 %v867_v41 }
 0x1fd   : > { %3359 = vmatpush3.bf16.msra.mxu0 %v3941_v35  ;;  %3448 = vmatprep.subr.bf16.mxu1 %v3942_v12  ;;  %v4793_v32 = vsel %vm4744_vm8, %v847_v61, 0  ;;  %v3951_v35 = vld [vmem:[#allocation7 + $0x198] sm:$0xff]   ;;  %v4801_v47 = vsel %vm4744_vm8, %v849_v50, 0  ;;  %v851_v41 = vor.u32 %v850_v37, %v798_v7  ;;  %v3958_v7 = vld [vmem:[#allocation7 + $0x1d0] sm:$0xff]  }
 0x1fe   : > { %3360 = vmatprep.subr.bf16.mxu0 %v3943_v40 }
 0x1ff   : > { %3449 = vmatpush3.bf16.msra.mxu1 %v3942_v12  ;;  %v3953_v12 = vld [vmem:[#allocation7 + $0x1a8] sm:$0xff]  }
 0x200   : > { %3450 = vmatprep.subr.bf16.mxu1 %v3944_v31 }
 0x201   : > { %3361 = vmatpush3.bf16.msra.mxu0 %v3943_v40  ;;  %v3954_v40 = vld [vmem:[#allocation7 + $0x1b0] sm:$0xff]  }
 0x202   : > { %3435 = vmatmul.mubr.bf16.gmra.mrb[8].mxu1 %v4639_v54 }
 0x203   : > { %3451 = vmatpush3.bf16.msra.mxu1 %v3944_v31  ;;  %3438 = vmatprep.mubr.bf16.mxu1 %v4667_v23  ;;  %v3955_v31 = vld [vmem:[#allocation7 + $0x1b8] sm:$0xff]  }
 0x204   : > { %3363 = vmatmul.mubr.bf16.vlgmr.msra.gmra.mrb[40].mxu0 %v868_v56  ;;  %3452 = vmatprep.subr.bf16.mxu1 %v3945_v46 }
 0x205   : > { %3366 = vmatprep.mubr.bf16.mxu0 %v4761_v49 }
 0x207   : > { %3453 = vmatpush3.bf16.msra.mxu1 %v3945_v46  ;;  %v4813_v46 = vsel %vm4744_vm8, %v851_v41, 0  ;;  %v4858_v41 = vld [vmem:[%s4993_s4] ss:$0 sm:$0xff] }
 0x208   : > { %3454 = vmatprep.subr.bf16.mxu1 %v3946_v3 }
 0x20a   : > { %3439 = vmatmul.mubr.bf16.gmra.mrb[12].mxu1 %v4690_v57 }
 0x20b   : > { %3455 = vmatpush3.bf16.msra.mxu1 %v3946_v3  ;;  %3458 = vmatprep.mubr.bf16.mxu1 %v868_v56  ;;  %v3957_v56 = vld [vmem:[#allocation7 + $0x1c8] sm:$0xff]   ;;  %v3959_v3 = vld [vmem:[#allocation7 + $0x1d8] sm:$0xff]  }
 0x20c   : > { %3367 = vmatmul.mubr.bf16.gmra.mrb[44].mxu0 %v4768_v17  ;;  %3456 = vmatprep.subr.bf16.mxu1 %v3947_v14 }
 0x20d   : > { %3370 = vmatprep.mubr.bf16.mxu0 %v4774_v36 }
 0x20f   : > { %3457 = vmatpush3.bf16.msra.mxu1 %v3947_v14  ;;  %v3961_v14 = vld [vmem:[#allocation7 + $0x1e8] sm:$0xff]  }
 0x210   : > { %3474 = vmatprep.subr.bf16.mxu1 %v3948_v16 }
 0x212   : > { %3459 = vmatmul.mubr.bf16.vlgmr.msra.gmra.mrb[0].mxu1 %v4761_v49 }
 0x213   : > { %3475 = vmatpush3.bf16.msra.mxu1 %v3948_v16  ;;  %3462 = vmatprep.mubr.bf16.mxu1 %v4768_v17 }
 0x214   : > { %3371 = vmatmul.mubr.bf16.gmra.mrb[48].mxu0 %v4785_v25  ;;  %3476 = vmatprep.subr.bf16.mxu1 %v3949_v22 }
 0x215   : > { %3374 = vmatprep.mubr.bf16.mxu0 %v4793_v32 }
 0x217   : > { %3477 = vmatpush3.bf16.msra.mxu1 %v3949_v22 }
 0x218   : > { %3478 = vmatprep.subr.bf16.mxu1 %v3950_v44 }
 0x21a   : > { %3463 = vmatmul.mubr.bf16.gmra.mrb[4].mxu1 %v4774_v36 }
 0x21b   : > { %3479 = vmatpush3.bf16.msra.mxu1 %v3950_v44  ;;  %3466 = vmatprep.mubr.bf16.mxu1 %v4785_v25 }
 0x21c   : > { %3375 = vmatmul.mubr.bf16.gmra.mrb[52].mxu0 %v4801_v47  ;;  %3480 = vmatprep.subr.bf16.mxu1 %v3951_v35 }
 0x21f   : > { %3481 = vmatpush3.bf16.msra.mxu1 %v3951_v35 }
 0x220   : > { %3482 = vmatprep.subr.bf16.mxu1 %v3952_v4 }
 0x222   : > { %3467 = vmatmul.mubr.bf16.gmra.mrb[8].mxu1 %v4793_v32 }
 0x223   : > { %3483 = vmatpush3.bf16.msra.mxu1 %v3952_v4  ;;  %3470 = vmatprep.mubr.bf16.mxu1 %v4801_v47 }
 0x224   : > { %3484 = vmatprep.subr.bf16.mxu1 %v3953_v12 }
 0x227   : > { %3485 = vmatpush3.bf16.msra.mxu1 %v3953_v12 }
 0x228   : > { %3486 = vmatprep.subr.bf16.mxu1 %v3954_v40 }
 0x22a   : > { %3471 = vmatmul.mubr.bf16.gmra.mrb[12].mxu1 %v4813_v46 }
 0x22b   : > { %3487 = vmatpush3.bf16.msra.mxu1 %v3954_v40  ;;  %3490 = vmatprep.mubr.bf16.mxu1 %v4579_v39  ;;  %v3960_v39 = vld [vmem:[#allocation7 + $0x1e0] sm:$0xff]  }
 0x22c   : > { %3488 = vmatprep.subr.bf16.mxu1 %v3955_v31 }
 0x22f   : > { %3489 = vmatpush3.bf16.msra.mxu1 %v3955_v31 }
 0x230   : > { %3506 = vmatprep.subr.bf16.mxu1 %v3956_v30 }
 0x232   : > { %3491 = vmatmul.mubr.bf16.vlgmr.msra.gmra.mrb[0].mxu1 %v4598_v0  ;;  %v807_v0 = vrot.slane %v805_v9, 7  ;;  %v3977_v9 = vld [vmem:[#allocation8 + $0x28] sm:$0xff]  }
 0x233   : > { %3507 = vmatpush3.bf16.msra.mxu1 %v3956_v30  ;;  %3494 = vmatprep.mubr.bf16.mxu1 %v4618_v28  ;;  %v3962_v28 = vld [vmem:[#allocation7 + $0x1f0] sm:$0xff]  }
 0x234   : > { %3508 = vmatprep.subr.bf16.mxu1 %v3957_v56 }
 0x237   : > { %3509 = vmatpush3.bf16.msra.mxu1 %v3957_v56 }
 0x238   : > { %3510 = vmatprep.subr.bf16.mxu1 %v3958_v7 }
 0x23a   : > { %3495 = vmatmul.mubr.bf16.gmra.mrb[4].mxu1 %v4643_v55  ;;  %v810_v55 = vor.u32 %v808_v2, %v807_v0  ;;  %v3969_v2 = vld [vmem:[#allocation7 + $0x228] sm:$0xff]  }
 0x23b   : > { %3511 = vmatpush3.bf16.msra.mxu1 %v3958_v7  ;;  %3498 = vmatprep.mubr.bf16.mxu1 %v4671_v26  ;;  %v3963_v26 = vld [vmem:[#allocation7 + $0x1f8] sm:$0xff]  }
 0x23c   : > { %3512 = vmatprep.subr.bf16.mxu1 %v3959_v3  ;;  %v833_v16 = vsel %vm4553_vm4, 0, %v810_v55 }
 0x23f   : > { %3513 = vmatpush3.bf16.msra.mxu1 %v3959_v3 }
 0x240   : > { %3514 = vmatprep.subr.bf16.mxu1 %v3960_v39 }
 0x242   : > { %3499 = vmatmul.mubr.bf16.gmra.mrb[8].mxu1 %v4694_v58  ;;  %v3964_v58 = vld [vmem:[#allocation7 + $0x200] sm:$0xff]  }
 0x243   : > { %3515 = vmatpush3.bf16.msra.mxu1 %v3960_v39  ;;  %3502 = vmatprep.mubr.bf16.mxu1 %v4714_v48  ;;  %v3965_v48 = vld [vmem:[#allocation7 + $0x208] sm:$0xff]  }
 0x244   : > { %3516 = vmatprep.subr.bf16.mxu1 %v3961_v14 }
 0x247   : > { %3517 = vmatpush3.bf16.msra.mxu1 %v3961_v14 }
 0x248   : > { %3518 = vmatprep.subr.bf16.mxu1 %v3962_v28 }
 0x24a   : > { %3503 = vmatmul.mubr.bf16.gmra.mrb[12].mxu1 %v833_v16 }
 0x24b   : > { %3519 = vmatpush3.bf16.msra.mxu1 %v3962_v28  ;;  %3522 = vmatprep.mubr.bf16.mxu1 %v4557_v19  ;;  %v3968_v19 = vld [vmem:[#allocation7 + $0x220] sm:$0xff]  }
 0x24c   : > { %3520 = vmatprep.subr.bf16.mxu1 %v3963_v26 }
 0x24f   : > { %3521 = vmatpush3.bf16.msra.mxu1 %v3963_v26 }
 0x250   : > { %3538 = vmatprep.subr.bf16.mxu1 %v3964_v58 }
 0x252   : > { %3523 = vmatmul.mubr.bf16.vlgmr.msra.gmra.mrb[0].mxu1 %v4575_v38  ;;  %v3970_v38 = vld [vmem:[#allocation7 + $0x230] sm:$0xff]  }
 0x253   : > { %3539 = vmatpush3.bf16.msra.mxu1 %v3964_v58  ;;  %3526 = vmatprep.mubr.bf16.mxu1 %v4594_v63  ;;  %v3971_v63 = vld [vmem:[#allocation7 + $0x238] sm:$0xff]  }
 0x254   : > { %3540 = vmatprep.subr.bf16.mxu1 %v3965_v48 }
 0x257   : > { %3541 = vmatpush3.bf16.msra.mxu1 %v3965_v48 }
 0x258   : > { %3542 = vmatprep.subr.bf16.mxu1 %v3966_v45 }
 0x25a   : > { %3527 = vmatmul.mubr.bf16.gmra.mrb[4].mxu1 %v4614_v27  ;;  %v3972_v27 = vld [vmem:[#allocation8] sm:$0xff]  }
 0x25b   : > { %3543 = vmatpush3.bf16.msra.mxu1 %v3966_v45  ;;  %3530 = vmatprep.mubr.bf16.mxu1 %v4639_v54  ;;  %v3973_v54 = vld [vmem:[#allocation8 + $0x8] sm:$0xff]  }
 0x25c   : > { %3544 = vmatprep.subr.bf16.mxu1 %v3967_v18  ;;  %3570 = vmatprep.subr.bf16.mxu0 %v3972_v27 }
 0x25d   : > { %3571 = vmatpush3.bf16.msra.mxu0 %v3972_v27 }
 0x25e   : > { %3572 = vmatprep.subr.bf16.mxu0 %v3973_v54 }
 0x25f   : > { %3545 = vmatpush3.bf16.msra.mxu1 %v3967_v18 }
 0x260   : > { %3546 = vmatprep.subr.bf16.mxu1 %v3968_v19 }
 0x261   : > { %3573 = vmatpush3.bf16.msra.mxu0 %v3973_v54 }
 0x262   : > { %3531 = vmatmul.mubr.bf16.gmra.mrb[8].mxu1 %v4667_v23  ;;  %v3974_v23 = vld [vmem:[#allocation8 + $0x10] sm:$0xff]  }
 0x263   : > { %3547 = vmatpush3.bf16.msra.mxu1 %v3968_v19  ;;  %3534 = vmatprep.mubr.bf16.mxu1 %v4690_v57  ;;  %v3975_v57 = vld [vmem:[#allocation8 + $0x18] sm:$0xff]  }
 0x264   : > { %3548 = vmatprep.subr.bf16.mxu1 %v3969_v2  ;;  %3574 = vmatprep.subr.bf16.mxu0 %v3974_v23 }
 0x265   : > { %3575 = vmatpush3.bf16.msra.mxu0 %v3974_v23 }
 0x266   : > { %3576 = vmatprep.subr.bf16.mxu0 %v3975_v57 }
 0x267   : > { %3549 = vmatpush3.bf16.msra.mxu1 %v3969_v2 }
 0x268   : > { %3550 = vmatprep.subr.bf16.mxu1 %v3970_v38 }
 0x269   : > { %3577 = vmatpush3.bf16.msra.mxu0 %v3975_v57 }
 0x26a   : > { %3535 = vmatmul.mubr.msk.bf16.gmra.mrb[12].mxu1 %vm3015_vm9, %v4716_v52  ;;  %3578 = vmatprep.subr.bf16.mxu0 %v3976_v15  ;;  %v876_v52 = vsel %vm4744_vm8, %v4733_v1, 0 }
 0x26b   : > { %3551 = vmatpush3.bf16.msra.mxu1 %v3970_v38  ;;  %3554 = vmatprep.mubr.bf16.mxu1 %v4761_v49  ;;  %v3978_v49 = vld [vmem:[#allocation8 + $0x30] sm:$0xff]  }
 0x26c   : > { %3552 = vmatprep.subr.bf16.mxu1 %v3971_v63 }
 0x26d   : > { %3579 = vmatpush3.bf16.msra.mxu0 %v3976_v15 }
 0x26e   : > { %3580 = vmatprep.subr.bf16.mxu0 %v3977_v9 }
 0x26f   : > { %3553 = vmatpush3.bf16.msra.mxu1 %v3971_v63 }
 0x270   : > { %3602 = vmatprep.subr.bf16.mxu1 %v3972_v27 }
 0x271   : > { %3581 = vmatpush3.bf16.msra.mxu0 %v3977_v9 }
 0x272   : > { %3555 = vmatmul.mubr.bf16.vlgmr.msra.gmra.mrb[0].mxu1 %v4768_v17  ;;  %3582 = vmatprep.subr.bf16.mxu0 %v3978_v49  ;;  %v3979_v17 = vld [vmem:[#allocation8 + $0x38] sm:$0xff]  }
 0x273   : > { %3558 = vmatprep.mubr.bf16.mxu1 %v4774_v36  ;;  %3610 = vmatpush3.bf16.msra.mxu1 %v3972_v27 }
 0x274   : > { %3603 = vmatprep.subr.bf16.mxu1 %v3973_v54 }
 0x275   : > { %3583 = vmatpush3.bf16.msra.mxu0 %v3978_v49 }
 0x276   : > { %3584 = vmatprep.subr.bf16.mxu0 %v3979_v17 }
 0x277   : > { %3611 = vmatpush3.bf16.msra.mxu1 %v3973_v54 }
 0x278   : > { %3604 = vmatprep.subr.bf16.mxu1 %v3974_v23 }
 0x279   : > { %3585 = vmatpush3.bf16.msra.mxu0 %v3979_v17 }
 0x27a   : > { %3559 = vmatmul.mubr.bf16.gmra.mrb[4].mxu1 %v4785_v25 }
 0x27b   : > { %3562 = vmatprep.mubr.bf16.mxu1 %v4793_v32  ;;  %3612 = vmatpush3.bf16.msra.mxu1 %v3974_v23 }
 0x27c   : > { %3605 = vmatprep.subr.bf16.mxu1 %v3975_v57 }
 0x27f   : > { %3613 = vmatpush3.bf16.msra.mxu1 %v3975_v57 }
 0x280   : > { %3606 = vmatprep.subr.bf16.mxu1 %v3976_v15 }
 0x282   : > { %3563 = vmatmul.mubr.bf16.gmra.mrb[8].mxu1 %v4801_v47 }
 0x283   : > { %3566 = vmatprep.mubr.bf16.mxu1 %v4813_v46  ;;  %3614 = vmatpush3.bf16.msra.mxu1 %v3976_v15 }
 0x284   : > { %3607 = vmatprep.subr.bf16.mxu1 %v3977_v9 }
 0x287   : > { %3615 = vmatpush3.bf16.msra.mxu1 %v3977_v9 }
 0x288   : > { %3608 = vmatprep.subr.bf16.mxu1 %v3978_v49 }
 0x28a   : > { %3567 = vmatmul.mubr.bf16.gmra.mrb[12].mxu1 %v876_v52 }
 0x28b   : > { %3616 = vmatpush3.bf16.msra.mxu1 %v3978_v49 }
 0x28c   : > { %3609 = vmatprep.subr.bf16.mxu1 %v3979_v17 }
 0x28f   : > { %3617 = vmatpush3.bf16.msra.mxu1 %v3979_v17 }
 0x2d7   : > { %v3364_v36 = vpop.f32.mrb[40].mxu0 }
 0x2d8   : > { %v1299_v21 = vpop.f32.mrb[41].mxu0 }
 0x2d9   : > { %v3365_v20 = vpop.f32.mrb[42].mxu0 }
 0x2da   : > { %v1302_v1 = vpop.f32.mrb[43].mxu0 }
 0x2df   : > { %v3368_v61 = vpop.f32.mrb[44].mxu0 }
 0x2e0   : > { %v1315_v22 = vpop.f32.mrb[45].mxu0 }
 0x2e1   : > { %v3369_v25 = vpop.f32.mrb[46].mxu0 }
 0x2e2   : > { %v1318_v11 = vpop.f32.mrb[47].mxu0 }
 0x2e7   : > { %v3372_v32 = vpop.f32.mrb[48].mxu0 }
 0x2e8   : > { %v1331_v44 = vpop.f32.mrb[49].mxu0 }
 0x2e9   : > { %v3373_v50 = vpop.f32.mrb[50].mxu0 }
 0x2ea   : > { %v1334_v35 = vpop.f32.mrb[51].mxu0 }
 0x2ef   : > { %v3376_v47 = vpop.f32.mrb[52].mxu0 }
 0x2f0   : > { %v4849_v4 = vpop.f32.mrb[53].mxu0 }
 0x2f1   : > { %v4851_v12 = vpop.f32.mrb[54].mxu0 }
 0x2f2   : > { %v4853_v37 = vpop.f32.mrb[55].mxu0 }
 0x345   : > { %v3556_v40 = vpop.f32.mrb[0].mxu1 }
 0x346   : > { %v3618_v31 = vadd.f32 %v3556_v40, %v3364_v36  ;;  %v2367_v46 = vpop.f32.mrb[1].mxu1 }
 0x347   : > { %v3619_v30 = vadd.f32 %v2367_v46, %v1299_v21  ;;  %v3557_v56 = vpop.f32.mrb[2].mxu1 }
 0x348   : > { %v2455_v7 = vadd.f32 %v3618_v31, %v4858_v41  ;;  %v3620_v3 = vadd.f32 %v3557_v56, %v3365_v20  ;;  %v2370_v39 = vpop.f32.mrb[3].mxu1 }
 0x349   : > { %v2453_v14 = vadd.f32 %v3619_v30, %v4858_v41  ;;  %v3621_v0 = vadd.f32 %v2370_v39, %v1302_v1 }
 0x34a   : > { %v2456_v28 = vadd.f32 %v3620_v3, %v4858_v41  ;;  %v2471_v26 = vmax.f32 %v2455_v7, 0.0 }
 0x34b   : > { %v2454_v55 = vadd.f32 %v3621_v0, %v4858_v41  ;;  %v2469_v58 = vmax.f32 %v2453_v14, 0.0 }
 0x34c   : > { %v2472_v16 = vmax.f32 %v2456_v28, 0.0 }
 0x34d   : > { %v2470_v48 = vmax.f32 %v2454_v55, 0.0  ;;  %v3560_v45 = vpop.f32.mrb[4].mxu1 }
 0x34e   : > { %v2486_v18 = vpack.c.bf16 %v2472_v16, %v2471_v26  ;;  %v3622_v19 = vadd.f32 %v3560_v45, %v3368_v61  ;;  %v2383_v2 = vpop.f32.mrb[5].mxu1 }
 0x34f   : > { %v3623_v38 = vadd.f32 %v2383_v2, %v1315_v22  ;;  %v3561_v63 = vpop.f32.mrb[6].mxu1  ;;  %v2485_v27 = vpack.c.bf16 %v2470_v48, %v2469_v58 }
 0x350   : > { %v2459_v54 = vadd.f32 %v3622_v19, %v4858_v41  ;;  %v3624_v23 = vadd.f32 %v3561_v63, %v3369_v25  ;;  %v2386_v57 = vpop.f32.mrb[7].mxu1 }
 0x351   : > { %v2457_v15 = vadd.f32 %v3623_v38, %v4858_v41  ;;  %v3625_v52 = vadd.f32 %v2386_v57, %v1318_v11  ;;  %3586 = vmatprep.mubr.bf16.mxu0 %v2485_v27 }
 0x352   : > { %v2460_v9 = vadd.f32 %v3624_v23, %v4858_v41  ;;  %3587 = vmatmul.mubr.bf16.vlgmr.msra.gmra.mrb[56].mxu0 %v2486_v18  ;;  %v2475_v17 = vmax.f32 %v2459_v54, 0.0 }
 0x353   : > { %v2458_v49 = vadd.f32 %v3625_v52, %v4858_v41  ;;  %v2473_v21 = vmax.f32 %v2457_v15, 0.0 }
 0x354   : > { %v2476_v36 = vmax.f32 %v2460_v9, 0.0 }
 0x355   : > { %v2474_v20 = vmax.f32 %v2458_v49, 0.0  ;;  %v3564_v1 = vpop.f32.mrb[8].mxu1 }
 0x356   : > { %v3626_v61 = vadd.f32 %v3564_v1, %v3372_v32  ;;  %v2399_v22 = vpop.f32.mrb[9].mxu1  ;;  %v2488_v40 = vpack.c.bf16 %v2476_v36, %v2475_v17 }
 0x357   : > { %v3627_v31 = vadd.f32 %v2399_v22, %v1331_v44  ;;  %v3565_v25 = vpop.f32.mrb[10].mxu1  ;;  %v2487_v46 = vpack.c.bf16 %v2474_v20, %v2473_v21 }
 0x358   : > { %v2463_v30 = vadd.f32 %v3626_v61, %v4858_v41  ;;  %v3628_v11 = vadd.f32 %v3565_v25, %v3373_v50  ;;  %v2402_v56 = vpop.f32.mrb[11].mxu1 }
 0x359   : > { %v2461_v7 = vadd.f32 %v3627_v31, %v4858_v41  ;;  %v3629_v3 = vadd.f32 %v2402_v56, %v1334_v35  ;;  %3590 = vmatprep.mubr.bf16.mxu0 %v2487_v46 }
 0x35a   : > { %v2464_v39 = vadd.f32 %v3628_v11, %v4858_v41  ;;  %3591 = vmatmul.mubr.bf16.gmra.mrb[60].mxu0 %v2488_v40  ;;  %v2479_v0 = vmax.f32 %v2463_v30, 0.0 }
 0x35b   : > { %v2462_v14 = vadd.f32 %v3629_v3, %v4858_v41  ;;  %v2477_v28 = vmax.f32 %v2461_v7, 0.0 }
 0x35c   : > { %v2480_v32 = vmax.f32 %v2464_v39, 0.0 }
 0x35d   : > { %v2478_v55 = vmax.f32 %v2462_v14, 0.0  ;;  %v3568_v44 = vpop.f32.mrb[12].mxu1 }
 0x35e   : > { %v3630_v26 = vadd.f32 %v3568_v44, %v3376_v47  ;;  %v2415_v16 = vpop.f32.mrb[13].mxu1  ;;  %v2490_v58 = vpack.c.bf16 %v2480_v32, %v2479_v0 }
 0x35f   : > { %v3631_v50 = vadd.f32 %v2415_v16, %v4849_v4  ;;  %v3569_v48 = vpop.f32.mrb[14].mxu1  ;;  %v2489_v45 = vpack.c.bf16 %v2478_v55, %v2477_v28 }
 0x360   : > { %v2467_v35 = vadd.f32 %v3630_v26, %v4858_v41  ;;  %v3632_v18 = vadd.f32 %v3569_v48, %v4851_v12  ;;  %v2418_v19 = vpop.f32.mrb[15].mxu1 }
 0x361   : > { %v2465_v2 = vadd.f32 %v3631_v50, %v4858_v41  ;;  %v3633_v38 = vadd.f32 %v2418_v19, %v4853_v37  ;;  %3594 = vmatprep.mubr.bf16.mxu0 %v2489_v45  ;;  %v4882_v37 = vld [vmem:[%s5040_s9] ss:$0 sm:$0xff] }
 0x362   : > { %v2468_v63 = vadd.f32 %v3632_v18, %v4858_v41  ;;  %3595 = vmatmul.mubr.bf16.gmra.mrb[64].mxu0 %v2490_v58  ;;  %v2483_v27 = vmax.f32 %v2467_v35, 0.0 }
 0x363   : > { %v2466_v47 = vadd.f32 %v3633_v38, %v4858_v41  ;;  %v2481_v4 = vmax.f32 %v2465_v2, 0.0 }
 0x364   : > { %v2484_v54 = vmax.f32 %v2468_v63, 0.0 }
 0x365   : > { %v2482_v23 = vmax.f32 %v2466_v47, 0.0 }
 0x366   : > { %v2492_v57 = vpack.c.bf16 %v2484_v54, %v2483_v27 }
 0x367   : > { %v2491_v15 = vpack.c.bf16 %v2482_v23, %v2481_v4 }
 0x369   : > { %3598 = vmatprep.mubr.bf16.mxu1 %v2491_v15 }
 0x36a   : > { %3599 = vmatmul.mubr.bf16.vlgmr.msra.gmra.mrb[16].mxu1 %v2492_v57 }
 0x425   : > { %v3588_v12 = vpop.f32.mrb[56].mxu0 }
 0x426   : > { %v2600_v52 = vadd.f32 %v3588_v12, %v4543_v5  ;;  %v2591_v9 = vpop.f32.mrb[57].mxu0 }
 0x427   : > { %v2592_v41 = vadd.f32 %v2591_v9, %v4534_v59  ;;  %v3589_v49 = vpop.f32.mrb[58].mxu0 }
 0x428   : > { %v2663_v17 = vadd.f32 %v4882_v37, %v2600_v52  ;;  %v2603_v36 = vadd.f32 %v3589_v49, %v4549_v10  ;;  %v2594_v21 = vpop.f32.mrb[59].mxu0 }
 0x429   : > { %v2661_v20 = vadd.f32 %v4882_v37, %v2592_v41  ;;  %v2595_v1 = vadd.f32 %v2594_v21, %v4538_v62 }
 0x42a   : > { %v2664_v61 = vadd.f32 %v4882_v37, %v2603_v36  ;;  %v2679_v40 = vmax.f32 %v2663_v17, 0.0 }
 0x42b   : > { %v2662_v22 = vadd.f32 %v4882_v37, %v2595_v1  ;;  %v2677_v31 = vmax.f32 %v2661_v20, 0.0 }
 0x42c   : > { %v2680_v5 = vmax.f32 %v2664_v61, 0.0 }
 0x42d   : > { %v2678_v25 = vmax.f32 %v2662_v22, 0.0  ;;  %v3592_v59 = vpop.f32.mrb[60].mxu0 }
 0x42e   : > { %v3083_v46 = vpack.c.bf16 %v2680_v5, %v2679_v40  ;;  %v2616_v30 = vadd.f32 %v3592_v59, %v4583_v43  ;;  %v2607_v11 = vpop.f32.mrb[61].mxu0 }
 0x42f   : > { %v3078_v10 = vpack.c.bf16 %v2678_v25, %v2677_v31  ;;  %v2608_v56 = vadd.f32 %v2607_v11, %v4565_v24  ;;  %v3593_v7 = vpop.f32.mrb[62].mxu0 }
 0x430   : > { %3115 = vst [vmem:[%s4895_s17 + $0x8] sm:$0xff] %v3083_v46   ;;  %v2667_v62 = vadd.f32 %v4882_v37, %v2616_v30  ;;  %v2619_v3 = vadd.f32 %v3593_v7, %v4590_v51  ;;  %v2610_v39 = vpop.f32.mrb[63].mxu0 }
 0x431   : > { %3079 = vst [vmem:[%s4895_s17] sm:$0xff] %v3078_v10   ;;  %v2665_v14 = vadd.f32 %v4882_v37, %v2608_v56  ;;  %v2611_v43 = vadd.f32 %v2610_v39, %v4571_v29 }
 0x432   : > { %v2668_v0 = vadd.f32 %v4882_v37, %v2619_v3  ;;  %v2683_v32 = vmax.f32 %v2667_v62, 0.0 }
 0x433   : > { %v2666_v24 = vadd.f32 %v4882_v37, %v2611_v43  ;;  %v2681_v55 = vmax.f32 %v2665_v14, 0.0 }
 0x434   : > { %v2684_v28 = vmax.f32 %v2668_v0, 0.0 }
 0x435   : > { %v2682_v44 = vmax.f32 %v2666_v24, 0.0  ;;  %v3596_v26 = vpop.f32.mrb[64].mxu0 }
 0x436   : > { %v3093_v16 = vpack.c.bf16 %v2684_v28, %v2683_v32  ;;  %v2632_v51 = vadd.f32 %v3596_v26, %v4628_v33  ;;  %v2623_v58 = vpop.f32.mrb[65].mxu0 }
 0x437   : > { %v3088_v50 = vpack.c.bf16 %v2682_v44, %v2681_v55  ;;  %v2624_v48 = vadd.f32 %v2623_v58, %v4602_v6  ;;  %v3597_v45 = vpop.f32.mrb[66].mxu0 }
 0x438   : > { %3117 = vst [vmem:[%s4895_s17 + $0x18] sm:$0xff] %v3093_v16   ;;  %v2671_v29 = vadd.f32 %v4882_v37, %v2632_v51  ;;  %v2635_v35 = vadd.f32 %v3597_v45, %v4634_v42  ;;  %v2626_v18 = vpop.f32.mrb[67].mxu0 }
 0x439   : > { %3116 = vst [vmem:[%s4895_s17 + $0x10] sm:$0xff] %v3088_v50   ;;  %v2669_v19 = vadd.f32 %v4882_v37, %v2624_v48  ;;  %v2627_v2 = vadd.f32 %v2626_v18, %v4608_v13 }
 0x43a   : > { %v2672_v33 = vadd.f32 %v4882_v37, %v2635_v35  ;;  %v2687_v6 = vmax.f32 %v2671_v29, 0.0 }
 0x43b   : > { %v2670_v38 = vadd.f32 %v4882_v37, %v2627_v2  ;;  %v2685_v47 = vmax.f32 %v2669_v19, 0.0 }
 0x43c   : > { %v2688_v63 = vmax.f32 %v2672_v33, 0.0 }
 0x43d   : > { %v2686_v27 = vmax.f32 %v2670_v38, 0.0  ;;  %v3600_v54 = vpop.f32.mrb[16].mxu1 }
 0x43e   : > { %v3103_v42 = vpack.c.bf16 %v2688_v63, %v2687_v6  ;;  %v2648_v4 = vadd.f32 %v3600_v54, %v4675_v34  ;;  %v2639_v23 = vpop.f32.mrb[17].mxu1 }
 0x43f   : > { %v3098_v57 = vpack.c.bf16 %v2686_v27, %v2685_v47  ;;  %v2640_v13 = vadd.f32 %v2639_v23, %v4647_v60  ;;  %v3601_v15 = vpop.f32.mrb[18].mxu1 }
 0x440   : > { %3119 = vst [vmem:[%s4895_s17 + $0x28] sm:$0xff] %v3103_v42   ;;  %v2675_v12 = vadd.f32 %v4882_v37, %v2648_v4  ;;  %v2651_v52 = vadd.f32 %v3601_v15, %v4683_v53  ;;  %v2642_v9 = vpop.f32.mrb[19].mxu1 }
 0x441   : > { %3118 = vst [vmem:[%s4895_s17 + $0x20] sm:$0xff] %v3098_v57   ;;  %v2673_v41 = vadd.f32 %v4882_v37, %v2640_v13  ;;  %v2643_v34 = vadd.f32 %v2642_v9, %v4656_v8 }
 0x442   : > { %v2676_v49 = vadd.f32 %v4882_v37, %v2651_v52  ;;  %v2691_v17 = vmax.f32 %v2675_v12, 0.0 }
 0x443   : > { %v2674_v60 = vadd.f32 %v4882_v37, %v2643_v34  ;;  %v2689_v53 = vmax.f32 %v2673_v41, 0.0 }
 0x444   : > { %v2692_v36 = vmax.f32 %v2676_v49, 0.0 }
 0x445   : > { %v2690_v21 = vmax.f32 %v2674_v60, 0.0 }
 0x446   : > { %v3113_v20 = vpack.c.bf16 %v2692_v36, %v2691_v17 }
 0x447   : > { %v3108_v8 = vpack.c.bf16 %v2690_v21, %v2689_v53 }
 0x448   : > { %3121 = vst [vmem:[%s4895_s17 + $0x38] sm:$0xff] %v3113_v20  }
 0x449   : > { %3120 = vst [vmem:[%s4895_s17 + $0x30] sm:$0xff] %v3108_v8  }
 0x44a   : > { %4107 = shalt.err (!%p4104_p11)
}
 0x44b   : > { %s4108_s9 = scalar_lea.hbm %s4931_s15, 1024  ;;  %s4112_s1 = scalar_lea.hbm %s5042_s13, 4096 }
 0x44c   : > { %p4109_p1 = scmp.ne.s32.totalorder %s4931_s15, %s4108_s9  ;;  %p4113_p0 = scmp.lt.u32.totalorder %s4931_s15, %s5042_s13 }
 0x44d   : > { %p4114_p2 = scmp.lt.u32.totalorder %s4112_s1, %s4108_s9  ;;  %p4116_p10 = scmp.lt.u32.totalorder %s4108_s9, %s4931_s15 }
 0x44e   : > { %p4110_p5 = pnand %p4109_p1, %p4416_p6 }
 0x44f   : > { %p4115_p4 = por %p4114_p2, %p4113_p0 }
 0x450   : > { %p4111_p9 = pneg %p4110_p5 }
 0x451   : > { %p4117_p8 = por %p4116_p10, %p4115_p4 }
 0x453   : > { %p4118_p13 = pnand %p4117_p8, %p4111_p9 }
 0x455   : > { %4121 = shalt.err (!%p4118_p13)
}
 0x456   : > { %s4212_s23 = smov 64   ;;  %s4213_s27 = smov 4  }
 0x457   : > { %3764 = dma.vmem_to_hbm [thread:$0]  (%p4416_p6), %s4933_s3, 1024, %s4931_s15, %s2774_s7, %s4212_s23, %s4212_s23, %s4213_s27  }
 0x458 PF: > { %s5043_s5 = sld [smem:[#allocation15_spill]]  ;;  %s5044_s11 = sld [smem:[#allocation17_spill]] }
 0x459   : > { %p3791_p3 = scmp.ge.s32.totalorder %s4200_s8, 2 }
 0x45e   : > { %s2805_s20 = sand.u32 1, %s5043_s5   ;;  %p5045_p7 = scmp.ne.s32.totalorder %s5044_s11, 0 }
 0x45f   : > { %s2806_s22 = scalar_lea.sflag [#allocation4], %s2805_s20 }
 0x460   : > { %p3781_p12 = pnand %p3791_p3, %p5045_p7 }
 0x462   : > { %4167 = dma.done.wait (!%p3781_p12), %s2806_s22, 1024  }
 0x463   : > { %4169 = vsyncadd (!%p3781_p12), %s2806_s22, 4294966272  ;;  %s25_s8 = sadd.s32 1, %s4200_s8   ;;  %s5046_s24 = smov %s4176_s25 }
 0x464   : > { %p22_p11 = scmp.ge.s32.totalorder %s25_s8, 6   ;;  %s5047_s25 = smov %s4180_s26 }
 0x465   : > { %s5048_s26 = smov %s4433_s12  ;;  %s5049_s27 = smov %s4192_s29 }
 0x466   : > { %s5050_s28 = smov %s4196_s30  ;;  %s5051_s29 = smov %s5054_s18 }
 0x467   : > { %s5052_s30 = smov %s5058_s16  ;;  %24 = sbr.rel (!%p22_p11) target bundleno = 15 (0xf), region = 113 }
 0x46e   :  { %2811 = vsyncpa [#allocation3], 1 }
 0x46f   :  { %2813 = vsyncpa [#allocation3 + $0x1], 1 }
 0x470   :  { %2814 = vsyncpa [#allocation6], 1 }
 0x471   :  { %2815 = vsyncpa [#allocation9], 1 }
 0x472   :  { %2816 = vsyncpa [#allocation4], 1 }
 0x473   :  { %2818 = vsyncpa [#allocation4 + $0x1], 1 }

</bundles_post_ra>
